<compile_context>
chip_gen: v7x
topology: tpu7x:2x2x1
jax: 0.10.0
libtpu: 0.0.40
codegen_flags: <defaults>
</compile_context>

<pallas_src>
import math
from functools import partial

import jax
import jax.numpy as jnp
from jax import lax
from jax.experimental import pallas as pl
from jax.experimental.pallas import tpu as pltpu

_BF16 = jnp.bfloat16


def _tpu_vmem_bytes():
    try:
        return int(pltpu.get_tpu_info().vmem_capacity_bytes)
    except Exception:
        return None


_VMEM_PHYS = _tpu_vmem_bytes()
if _VMEM_PHYS is not None and _VMEM_PHYS >= 100 * 1024 * 1024:   # v5e / v6e (128 MiB)
    _VMEM_LIMIT = 96 * 1024 * 1024
    _ROW_TILE_CAP = 1024
else:                                                             # v7x (64 MiB) / unknown
    _VMEM_LIMIT = 48 * 1024 * 1024
    _ROW_TILE_CAP = 512


def _mosaic(*sem):
    return pltpu.CompilerParams(dimension_semantics=sem,
                                vmem_limit_bytes=_VMEM_LIMIT)


def _round_up(x, m):
    return (x + m - 1) // m * m


def _row_tile(m):
    # 16-row alignment is safe for both f32 and bf16 outputs.
    return min(_round_up(m, 16), _ROW_TILE_CAP)


def _pad_rows(x, tile):
    m = x.shape[0]
    mp = _round_up(m, tile)
    if mp != m:
        x = jnp.pad(x, ((0, mp - m), (0, 0)))
    return x


def _q_tile(t, cap=256):
    """Query tile for attention: largest multiple of 8 <= cap dividing T, else T."""
    if t <= cap:
        return t
    for tt in range(cap - cap % 8, 7, -8):
        if t % tt == 0:
            return tt
    return t  # TODO(synk): pad T to a multiple of 8 for ragged long sequences.


def _ln(x, g, b, eps=1e-5):
    mean = jnp.mean(x, axis=-1, keepdims=True)
    var = jnp.mean(jnp.square(x - mean), axis=-1, keepdims=True)
    return (x - mean) * lax.rsqrt(var + eps) * g + b


# ----------------------------------------------------------------------------
# Row-tiled kernels: Linear, LayerNorm, LayerNorm+QKV projection, fused FFN block
# ----------------------------------------------------------------------------
def _linear_kernel(x_ref, w_ref, b_ref, o_ref):
    y = jnp.dot(x_ref[...].astype(_BF16), w_ref[...],
                preferred_element_type=jnp.float32) + b_ref[...]
    o_ref[...] = y.astype(o_ref.dtype)


def linear(x, w, b, out_dtype=jnp.float32):
    M, K = x.shape
    N = w.shape[1]
    tm = _row_tile(M)
    xp = _pad_rows(x, tm)
    Mp = xp.shape[0]
    out = pl.pallas_call(
        _linear_kernel,
        out_shape=jax.ShapeDtypeStruct((Mp, N), out_dtype),
        grid=(Mp // tm,),
        in_specs=[pl.BlockSpec((tm, K), lambda i: (i, 0)),
                  pl.BlockSpec((K, N), lambda i: (0, 0)),
                  pl.BlockSpec((1, N), lambda i: (0, 0))],
        out_specs=pl.BlockSpec((tm, N), lambda i: (i, 0)),
        compiler_params=_mosaic("parallel"),
    )(xp, w.astype(_BF16), b.reshape(1, N))
    return out[:M]


def _layernorm_kernel(x_ref, g_ref, b_ref, o_ref):
    o_ref[...] = _ln(x_ref[...], g_ref[...], b_ref[...]).astype(o_ref.dtype)


def layernorm(x, gamma, beta):
    M, D = x.shape
    tm = _row_tile(M)
    xp = _pad_rows(x, tm)
    Mp = xp.shape[0]
    out = pl.pallas_call(
        _layernorm_kernel,
        out_shape=jax.ShapeDtypeStruct((Mp, D), jnp.float32),
        grid=(Mp // tm,),
        in_specs=[pl.BlockSpec((tm, D), lambda i: (i, 0)),
                  pl.BlockSpec((1, D), lambda i: (0, 0)),
                  pl.BlockSpec((1, D), lambda i: (0, 0))],
        out_specs=pl.BlockSpec((tm, D), lambda i: (i, 0)),
        compiler_params=_mosaic("parallel"),
    )(xp, gamma, beta)
    return out[:M]


def _ln_qkv_kernel(x_ref, g_ref, b_ref, wq_ref, bq_ref, wkv_ref, bkv_ref,
                   q_ref, kv_ref):
    xn = _ln(x_ref[...], g_ref[...], b_ref[...]).astype(_BF16)
    q = jnp.dot(xn, wq_ref[...], preferred_element_type=jnp.float32) + bq_ref[...]
    kv = jnp.dot(xn, wkv_ref[...], preferred_element_type=jnp.float32) + bkv_ref[...]
    q_ref[...] = q.astype(q_ref.dtype)
    kv_ref[...] = kv.astype(kv_ref.dtype)


def ln_qkv(x, gamma, beta, wq, bq, wkv, bkv):
    """Fused LayerNorm -> (Q, KV) projections; bf16 outputs (scale folded into wq/bq)."""
    M, Din = x.shape
    D = wq.shape[1]
    tm = _row_tile(M)
    xp = _pad_rows(x, tm)
    Mp = xp.shape[0]
    q, kv = pl.pallas_call(
        _ln_qkv_kernel,
        out_shape=(jax.ShapeDtypeStruct((Mp, D), _BF16),
                   jax.ShapeDtypeStruct((Mp, 2 * D), _BF16)),
        grid=(Mp // tm,),
        in_specs=[pl.BlockSpec((tm, Din), lambda i: (i, 0)),
                  pl.BlockSpec((1, Din), lambda i: (0, 0)),
                  pl.BlockSpec((1, Din), lambda i: (0, 0)),
                  pl.BlockSpec((Din, D), lambda i: (0, 0)),
                  pl.BlockSpec((1, D), lambda i: (0, 0)),
                  pl.BlockSpec((Din, 2 * D), lambda i: (0, 0)),
                  pl.BlockSpec((1, 2 * D), lambda i: (0, 0))],
        out_specs=[pl.BlockSpec((tm, D), lambda i: (i, 0)),
                   pl.BlockSpec((tm, 2 * D), lambda i: (i, 0))],
        compiler_params=_mosaic("parallel"),
    )(xp, gamma, beta, wq.astype(_BF16), bq, wkv.astype(_BF16), bkv)
    return q[:M], kv[:M]


def _ffn_kernel(x_ref, g_ref, b_ref, w1_ref, b1_ref, w2_ref, b2_ref,
                pg_ref, pb_ref, o_ref, *, scale, post_norm):
    # out = [post-LN]( x + scale * FF(LN(x)) ),  FF = Linear -> Swish -> Linear
    x = x_ref[...]
    xn = _ln(x, g_ref[...], b_ref[...])
    h = jnp.dot(xn.astype(_BF16), w1_ref[...],
                preferred_element_type=jnp.float32) + b1_ref[...]
    h = h * jax.nn.sigmoid(h)                                   # Swish
    y = jnp.dot(h.astype(_BF16), w2_ref[...],
                preferred_element_type=jnp.float32) + b2_ref[...]
    out = x + scale * y
    if post_norm:
        out = _ln(out, pg_ref[...], pb_ref[...])
    o_ref[...] = out.astype(o_ref.dtype)


def ffn_block(x, gamma, beta, w1, b1, w2, b2, scale, post_norm=None):
    M, D = x.shape
    F = w1.shape[1]
    tm = _row_tile(M)
    xp = _pad_rows(x, tm)
    Mp = xp.shape[0]
    if post_norm is not None:
        pg, pb = post_norm
        has_post = True
    else:
        pg = jnp.ones((1, D), jnp.float32)
        pb = jnp.zeros((1, D), jnp.float32)
        has_post = False
    kern = partial(_ffn_kernel, scale=scale, post_norm=has_post)
    out = pl.pallas_call(
        kern,
        out_shape=jax.ShapeDtypeStruct((Mp, D), jnp.float32),
        grid=(Mp // tm,),
        in_specs=[pl.BlockSpec((tm, D), lambda i: (i, 0)),
                  pl.BlockSpec((1, D), lambda i: (0, 0)),
                  pl.BlockSpec((1, D), lambda i: (0, 0)),
                  pl.BlockSpec((D, F), lambda i: (0, 0)),
                  pl.BlockSpec((1, F), lambda i: (0, 0)),
                  pl.BlockSpec((F, D), lambda i: (0, 0)),
                  pl.BlockSpec((1, D), lambda i: (0, 0)),
                  pl.BlockSpec((1, D), lambda i: (0, 0)),
                  pl.BlockSpec((1, D), lambda i: (0, 0))],
        out_specs=pl.BlockSpec((tm, D), lambda i: (i, 0)),
        compiler_params=_mosaic("parallel"),
    )(xp, gamma, beta, w1.astype(_BF16), b1, w2.astype(_BF16), b2, pg, pb)
    return out[:M]


# ----------------------------------------------------------------------------
# Relative-position multi-head attention: grid (B, T/tq), both axes parallel.
# Fuses pos_bias_u add, bias/mask add, softmax, P@V, out-projection, residual.
# Scale is already folded into q / pos_bias_u / the bd bias.
# ----------------------------------------------------------------------------
def _attn_kernel(q_ref, kv_ref, bd_ref, mask_ref, u_ref, wo_ref, bo_ref, res_ref,
                 o_ref, *, num_heads, head_dim):
    D = num_heads * head_dim
    q = q_ref[0].astype(jnp.float32) + u_ref[...]      # (tq, D) f32, scale folded in
    kv = kv_ref[0]                                      # (T, 2D) bf16
    m = mask_ref[0]                                     # (1, T) f32 additive key mask

    ctx = []
    for h in range(num_heads):
        sl = slice(h * head_dim, (h + 1) * head_dim)
        qh = q[:, sl].astype(_BF16)                     # (tq, Dh)
        kh = kv[:, sl]                                  # (T, Dh) bf16
        vh = kv[:, D + h * head_dim:D + (h + 1) * head_dim]
        # matrix_ac = (q*s + u*s) k^T   (tq, T), f32 accumulation
        ac = lax.dot_general(qh, kh, (((1,), (1,)), ((), ())),
                             preferred_element_type=jnp.float32)
        scores = ac + bd_ref[0, h].astype(jnp.float32) + m   # f32 mask / softmax
        scores = scores - jnp.max(scores, axis=-1, keepdims=True)
        e = jnp.exp(scores)
        inv = pl.reciprocal(jnp.sum(e, axis=-1, keepdims=True), approx=True)
        p = (e * inv).astype(_BF16)
        ctx.append(jnp.dot(p, vh, preferred_element_type=jnp.float32))  # (tq, Dh)
    ctx = jnp.concatenate(ctx, axis=-1)                                  # (tq, D)
    out = jnp.dot(ctx.astype(_BF16), wo_ref[...],
                  preferred_element_type=jnp.float32) + bo_ref[...]
    o_ref[0] = (res_ref[0] + out).astype(o_ref.dtype)


def rel_attention(q, kv, bd, mask_add, u_flat, wo, bo, residual, num_heads):
    B, T, D = q.shape
    Dh = D // num_heads
    tq = _q_tile(T)
    nq = T // tq
    kern = partial(_attn_kernel, num_heads=num_heads, head_dim=Dh)
    return pl.pallas_call(
        kern,
        out_shape=jax.ShapeDtypeStruct((B, T, D), jnp.float32),
        grid=(B, nq),
        in_specs=[pl.BlockSpec((1, tq, D), lambda b, i: (b, i, 0)),
                  pl.BlockSpec((1, T, 2 * D), lambda b, i: (b, 0, 0)),
                  pl.BlockSpec((1, num_heads, tq, T), lambda b, i: (b, 0, i, 0)),
                  pl.BlockSpec((1, 1, T), lambda b, i: (b, 0, 0)),
                  pl.BlockSpec((1, D), lambda b, i: (0, 0)),
                  pl.BlockSpec((D, D), lambda b, i: (0, 0)),
                  pl.BlockSpec((1, D), lambda b, i: (0, 0)),
                  pl.BlockSpec((1, tq, D), lambda b, i: (b, i, 0))],
        out_specs=pl.BlockSpec((1, tq, D), lambda b, i: (b, i, 0)),
        compiler_params=_mosaic("parallel", "parallel"),
    )(q, kv, bd, mask_add, u_flat, wo.astype(_BF16), bo.reshape(1, D), residual)


# ----------------------------------------------------------------------------
# Convolution module, fused with pre-LayerNorm (norm_conv) and residual add.
# Depthwise conv via pltpu.roll (XLU) + iota boundary mask (no concat copies).
# ----------------------------------------------------------------------------
def _conv_block_kernel(x_ref, lng1_ref, lnb1_ref, w1_ref, b1_ref, dw_ref, dwb_ref,
                       lng2_ref, lnb2_ref, w2_ref, b2_ref, o_ref, *, ksize):
    T, C = o_ref.shape[1], o_ref.shape[2]
    pad = (ksize - 1) // 2
    x = x_ref[0]                                                  # (T, C) residual in
    xn = _ln(x, lng1_ref[...], lnb1_ref[...])                     # norm_conv
    y = jnp.dot(xn.astype(_BF16), w1_ref[...],
                preferred_element_type=jnp.float32) + b1_ref[...]  # pointwise conv1
    u = y[:, :C] * jax.nn.sigmoid(y[:, C:])                       # GLU

    # depthwise conv: XLU roll + boundary mask (zero padding), no big copies
    t_idx = lax.broadcasted_iota(jnp.int32, (T, C), 0)
    acc = jnp.zeros((T, C), jnp.float32)
    for kk in range(ksize):
        off = kk - pad
        if off == 0:
            sh = u
        else:
            rolled = pltpu.roll(u, shift=(-off) % T, axis=0)      # rolled[t] = u[t+off]
            valid = jnp.logical_and(t_idx + off >= 0, t_idx + off < T)
            sh = jnp.where(valid, rolled, 0.0)
        acc = acc + sh * dw_ref[kk:kk + 1, :]
    acc = acc + dwb_ref[...]

    ln2 = _ln(acc, lng2_ref[...], lnb2_ref[...])
    sw = ln2 * jax.nn.sigmoid(ln2)                                # Swish
    out = jnp.dot(sw.astype(_BF16), w2_ref[...],
                  preferred_element_type=jnp.float32) + b2_ref[...]  # pointwise conv2
    o_ref[0] = (x + out).astype(o_ref.dtype)                      # residual add


def conv_block(x, ln_params, cp, ksize):
    # x: (B, T, C) residual-stream input (pre norm_conv)
    B, T, C = x.shape
    kern = partial(_conv_block_kernel, ksize=ksize)
    return pl.pallas_call(
        kern,
        out_shape=jax.ShapeDtypeStruct((B, T, C), jnp.float32),
        grid=(B,),
        in_specs=[pl.BlockSpec((1, T, C), lambda b: (b, 0, 0)),
                  pl.BlockSpec((1, C), lambda b: (0, 0)),
                  pl.BlockSpec((1, C), lambda b: (0, 0)),
                  pl.BlockSpec((C, 2 * C), lambda b: (0, 0)),
                  pl.BlockSpec((1, 2 * C), lambda b: (0, 0)),
                  pl.BlockSpec((ksize, C), lambda b: (0, 0)),
                  pl.BlockSpec((1, C), lambda b: (0, 0)),
                  pl.BlockSpec((1, C), lambda b: (0, 0)),
                  pl.BlockSpec((1, C), lambda b: (0, 0)),
                  pl.BlockSpec((C, C), lambda b: (0, 0)),
                  pl.BlockSpec((1, C), lambda b: (0, 0))],
        out_specs=pl.BlockSpec((1, T, C), lambda b: (b, 0, 0)),
        compiler_params=_mosaic("parallel"),
    )(x, ln_params[0], ln_params[1],
      cp['w1'].astype(_BF16), cp['b1'], cp['dw'], cp['dwb'],
      cp['ln_g'], cp['ln_b'], cp['w2'].astype(_BF16), cp['b2'])


# ----------------------------------------------------------------------------
# Plain-JAX glue: positional encoding, rel-shifted bias, parameter init
# ----------------------------------------------------------------------------
def rel_pos_emb(T, D):
    # enc(r) for relative positions r = T-1 ... -(T-1) (matches RelPositionalEncoding)
    pos = jnp.arange(T - 1, -T, -1, dtype=jnp.float32)[:, None]       # (2T-1, 1)
    div = jnp.exp(jnp.arange(0, D, 2, dtype=jnp.float32)
                  * (-math.log(10000.0) / D))                         # (D/2,)
    pe = jnp.zeros((2 * T - 1, D), jnp.float32)
    pe = pe.at[:, 0::2].set(jnp.sin(pos * div))
    pe = pe.at[:, 1::2].set(jnp.cos(pos * div))
    return pe


def rel_pos_bias(q_scaled, pos_bias_v_scaled, p, num_heads):
    """bd[b,h,i,j] = (q*s + v*s)_{b,i,h} . p_{T-1-i+j,h}  -- gather-free skew, bf16 out."""
    B, T, D = q_scaled.shape
    H = num_heads
    Dh = D // H
    N = 2 * T - 1
    qv = (q_scaled.astype(jnp.float32).reshape(B, T, H, Dh)
          + pos_bias_v_scaled[None, None]).astype(_BF16)
    ph = p.reshape(N, H, Dh).astype(_BF16)
    bd_full = jnp.einsum('bthd,nhd->bhtn', qv, ph,
                         preferred_element_type=jnp.float32)          # (B,H,T,2T-1)
    # rel_shift via the standard static strided-slice trick (O(T^2), no gather):
    flat = bd_full.reshape(B, H, T * N)
    z = lax.slice_in_dim(flat, T - 1, T - 1 + T * (N - 1), axis=2)
    return z.reshape(B, H, T, N - 1)[..., :T].astype(_BF16)           # (B,H,T,T) bf16


def init_params(key, d_model, num_heads, dim_ff, ksize, num_layers):
    D, F, H = d_model, dim_ff, num_heads
    Dh = D // H
    keys = iter(jax.random.split(key, 64))

    def nrm(shape, scale=0.05):
        return scale * jax.random.normal(next(keys), shape, jnp.float32)

    ones = lambda n: jnp.ones((1, n), jnp.float32)
    zeros = lambda n: jnp.zeros((1, n), jnp.float32)

    layer = dict(
        norm_ff_macaron=(ones(D), zeros(D)),
        ffm_w1=nrm((D, F)), ffm_b1=nrm((1, F)),
        ffm_w2=nrm((F, D)), ffm_b2=nrm((1, D)),
        norm_mha=(ones(D), zeros(D)),
        in_proj_w=nrm((D, 3 * D)), in_proj_b=jnp.zeros((3 * D,), jnp.float32),
        out_proj_w=nrm((D, D)), out_proj_b=jnp.zeros((D,), jnp.float32),
        linear_pos_w=nrm((D, D)),
        pos_bias_u=nrm((H, Dh)), pos_bias_v=nrm((H, Dh)),
        norm_conv=(ones(D), zeros(D)),
        conv=dict(
            w1=nrm((D, 2 * D)), b1=nrm((1, 2 * D)),
            dw=nrm((ksize, D)), dwb=nrm((1, D)),
            ln_g=ones(D), ln_b=zeros(D),
            w2=nrm((D, D)), b2=nrm((1, D)),
        ),
        norm_ff=(ones(D), zeros(D)),
        ff_w1=nrm((D, F)), ff_b1=nrm((1, F)),
        ff_w2=nrm((F, D)), ff_b2=nrm((1, D)),
        norm_final=(ones(D), zeros(D)),
    )
    # reference uses copy.deepcopy(encoder_layer): all layers share identical init
    return dict(layers=[layer] * num_layers,
                after_norm=(ones(D), zeros(D)))


# ----------------------------------------------------------------------------
# Forward pass (mirrors Transformer.forward, eval-mode dropout)
# ----------------------------------------------------------------------------
def transformer_forward(x, key_padding_mask, params, num_heads, ksize):
    B, T, D = x.shape
    H = num_heads
    Dh = D // H
    scale = float(Dh) ** (-0.5)

    pos_emb = rel_pos_emb(T, D)                                        # (2T-1, D)
    mask_add = jnp.where(key_padding_mask, jnp.float32(-1e30),
                         jnp.float32(0.0)).reshape(B, 1, T)            # f32 key mask

    # residual stream: (B*T, D) f32, rows in (batch, time) order -> no transposes
    h = (x * math.sqrt(D)).astype(jnp.float32).reshape(B * T, D)

    for lp in params['layers']:
        # 1) macaron feed-forward (fused LN + FF + 0.5*residual)
        h = ffn_block(h, *lp['norm_ff_macaron'],
                      lp['ffm_w1'], lp['ffm_b1'], lp['ffm_w2'], lp['ffm_b2'], 0.5)

        # 2) relative-position multi-head self-attention
        #    scale folded into Q projection / pos_bias_u / pos_bias_v (no score mul)
        wq = lp['in_proj_w'][:, :D] * scale
        bq = lp['in_proj_b'][:D].reshape(1, D) * scale
        wkv = lp['in_proj_w'][:, D:]
        bkv = lp['in_proj_b'][D:].reshape(1, 2 * D)
        q, kv = ln_qkv(h, *lp['norm_mha'], wq, bq, wkv, bkv)           # bf16 activations
        q3 = q.reshape(B, T, D)
        kv3 = kv.reshape(B, T, 2 * D)
        # positional projection (no bias, bf16) + gather-free rel-shifted bf16 bias
        p = linear(pos_emb, lp['linear_pos_w'], jnp.zeros((D,), jnp.float32),
                   out_dtype=_BF16)
        bd = rel_pos_bias(q3, lp['pos_bias_v'] * scale, p, H)          # (B,H,T,T) bf16
        u_scaled = (lp['pos_bias_u'] * scale).reshape(1, D)
        h = rel_attention(q3, kv3, bd, mask_add, u_scaled,
                          lp['out_proj_w'], lp['out_proj_b'],
                          h.reshape(B, T, D), H).reshape(B * T, D)

        # 3) convolution module (fused norm_conv + conv module + residual;
        #    the layer does not pass the key-padding mask to the conv module)
        h = conv_block(h.reshape(B, T, D), lp['norm_conv'],
                       lp['conv'], ksize).reshape(B * T, D)

        # 4+5) feed-forward + per-layer final norm (fused post-norm)
        h = ffn_block(h, *lp['norm_ff'],
                      lp['ff_w1'], lp['ff_b1'], lp['ff_w2'], lp['ff_b2'], 1.0,
                      post_norm=lp['norm_final'])

    h = layernorm(h, *params['after_norm'])
    return h.reshape(B, T, D)


# ----------------------------------------------------------------------------
if __name__ == "__main__":
    D_MODEL, NUM_HEADS, DIM_FF, CNN_KERNEL, NUM_LAYERS = 32, 2, 64, 5, 2
    B, T = 2, 8

    root = jax.random.PRNGKey(0)
    k_params, k_x = jax.random.split(root)
    params = init_params(k_params, D_MODEL, NUM_HEADS, DIM_FF, CNN_KERNEL, NUM_LAYERS)

    x = jax.random.normal(k_x, (B, T, D_MODEL), jnp.float32)
    key_padding_mask = jnp.zeros((B, T), dtype=bool).at[1, 6:].set(True)

    @jax.jit
    def run(x, m):
        return transformer_forward(x, m, params, NUM_HEADS, CNN_KERNEL)

    out = run(x, key_padding_mask)
    out = jax.block_until_ready(out)
    assert out.shape == (B, T, D_MODEL)
    assert bool(jnp.all(jnp.isfinite(out)))
    print("KERNEL_OK")
</pallas_src>

<mosaic_0001>
module attributes {stable_mosaic.version = 11 : i64} {
  func.func @_ln_qkv_kernel(%arg0: i32, %arg1: memref<16x32xf32, #tpu.memory_space<vmem>>, %arg2: memref<1x32xf32, #tpu.memory_space<vmem>>, %arg3: memref<1x32xf32, #tpu.memory_space<vmem>>, %arg4: memref<32x32xbf16, #tpu.memory_space<vmem>>, %arg5: memref<1x32xf32, #tpu.memory_space<vmem>>, %arg6: memref<32x64xbf16, #tpu.memory_space<vmem>>, %arg7: memref<1x64xf32, #tpu.memory_space<vmem>>, %arg8: memref<16x32xbf16, #tpu.memory_space<vmem>>, %arg9: memref<16x64xbf16, #tpu.memory_space<vmem>>) attributes {dimension_semantics = [#tpu.dimension_semantics<parallel>], iteration_bounds = array<i64: 1>, scalar_prefetch = 0 : i64, scratch_operands = 0 : i64, tpu.core_type = #tpu.core_type<tc>, window_params = [{transform_indices = @transform_0, window_bounds = array<i64: 16, 32>}, {pipeline_mode = #tpu.pipeline_mode<synchronous>, transform_indices = @transform_1, window_bounds = array<i64: 1, 32>}, {pipeline_mode = #tpu.pipeline_mode<synchronous>, transform_indices = @transform_2, window_bounds = array<i64: 1, 32>}, {pipeline_mode = #tpu.pipeline_mode<synchronous>, transform_indices = @transform_3, window_bounds = array<i64: 32, 32>}, {pipeline_mode = #tpu.pipeline_mode<synchronous>, transform_indices = @transform_4, window_bounds = array<i64: 1, 32>}, {pipeline_mode = #tpu.pipeline_mode<synchronous>, transform_indices = @transform_5, window_bounds = array<i64: 32, 64>}, {pipeline_mode = #tpu.pipeline_mode<synchronous>, transform_indices = @transform_6, window_bounds = array<i64: 1, 64>}, {transform_indices = @transform_7, window_bounds = array<i64: 16, 32>}, {transform_indices = @transform_8, window_bounds = array<i64: 16, 64>}]} {
    %c0 = arith.constant 0 : index
    %c0_0 = arith.constant 0 : index
    %0 = vector.load %arg1[%c0, %c0_0] : memref<16x32xf32, #tpu.memory_space<vmem>>, vector<16x32xf32>
    %c0_1 = arith.constant 0 : index
    %c0_2 = arith.constant 0 : index
    %1 = vector.load %arg2[%c0_1, %c0_2] : memref<1x32xf32, #tpu.memory_space<vmem>>, vector<1x32xf32>
    %c0_3 = arith.constant 0 : index
    %c0_4 = arith.constant 0 : index
    %2 = vector.load %arg3[%c0_3, %c0_4] : memref<1x32xf32, #tpu.memory_space<vmem>>, vector<1x32xf32>
    %cst = arith.constant dense<0.000000e+00> : vector<16xf32>
    %3 = vector.multi_reduction <add>, %0, %cst [1] : vector<16x32xf32> to vector<16xf32>
    %4 = vector.shape_cast %3 : vector<16xf32> to vector<16x1xf32>
    %cst_5 = arith.constant 3.200000e+01 : f32
    %5 = vector.broadcast %cst_5 : f32 to vector<16x1xf32>
    %6 = arith.divf %4, %5 : vector<16x1xf32>
    %7 = vector.broadcast %6 : vector<16x1xf32> to vector<16x32xf32>
    %8 = arith.subf %0, %7 : vector<16x32xf32>
    %9 = arith.mulf %8, %8 : vector<16x32xf32>
    %cst_6 = arith.constant dense<0.000000e+00> : vector<16xf32>
    %10 = vector.multi_reduction <add>, %9, %cst_6 [1] : vector<16x32xf32> to vector<16xf32>
    %11 = vector.shape_cast %10 : vector<16xf32> to vector<16x1xf32>
    %cst_7 = arith.constant 3.200000e+01 : f32
    %12 = vector.broadcast %cst_7 : f32 to vector<16x1xf32>
    %13 = arith.divf %11, %12 : vector<16x1xf32>
    %14 = vector.broadcast %6 : vector<16x1xf32> to vector<16x32xf32>
    %15 = arith.subf %0, %14 : vector<16x32xf32>
    %cst_8 = arith.constant 9.99999974E-6 : f32
    %16 = vector.broadcast %cst_8 : f32 to vector<16x1xf32>
    %17 = arith.addf %13, %16 : vector<16x1xf32>
    %18 = math.rsqrt %17 : vector<16x1xf32>
    %19 = vector.broadcast %18 : vector<16x1xf32> to vector<16x32xf32>
    %20 = arith.mulf %15, %19 : vector<16x32xf32>
    %21 = vector.broadcast %1 : vector<1x32xf32> to vector<16x32xf32>
    %22 = arith.mulf %20, %21 : vector<16x32xf32>
    %23 = vector.broadcast %2 : vector<1x32xf32> to vector<16x32xf32>
    %24 = arith.addf %22, %23 : vector<16x32xf32>
    %25 = arith.truncf %24 : vector<16x32xf32> to vector<16x32xbf16>
    %c0_9 = arith.constant 0 : index
    %c0_10 = arith.constant 0 : index
    %26 = vector.load %arg4[%c0_9, %c0_10] : memref<32x32xbf16, #tpu.memory_space<vmem>>, vector<32x32xbf16>
    %cst_11 = arith.constant dense<0.000000e+00> : vector<16x32xf32>
    %27 = tpu.matmul %25, %26, %cst_11 {dimension_numbers = #tpu.dot_dimension_numbers<[1], [0], [0], [1], [0, 0, 1, 1], [], []>} : vector<16x32xbf16>, vector<32x32xbf16>, vector<16x32xf32> -> vector<16x32xf32>
    %c0_12 = arith.constant 0 : index
    %c0_13 = arith.constant 0 : index
    %28 = vector.load %arg5[%c0_12, %c0_13] : memref<1x32xf32, #tpu.memory_space<vmem>>, vector<1x32xf32>
    %29 = vector.broadcast %28 : vector<1x32xf32> to vector<16x32xf32>
    %30 = arith.addf %27, %29 : vector<16x32xf32>
    %c0_14 = arith.constant 0 : index
    %c0_15 = arith.constant 0 : index
    %31 = vector.load %arg6[%c0_14, %c0_15] : memref<32x64xbf16, #tpu.memory_space<vmem>>, vector<32x64xbf16>
    %cst_16 = arith.constant dense<0.000000e+00> : vector<16x64xf32>
    %32 = tpu.matmul %25, %31, %cst_16 {dimension_numbers = #tpu.dot_dimension_numbers<[1], [0], [0], [1], [0, 0, 1, 1], [], []>} : vector<16x32xbf16>, vector<32x64xbf16>, vector<16x64xf32> -> vector<16x64xf32>
    %c0_17 = arith.constant 0 : index
    %c0_18 = arith.constant 0 : index
    %33 = vector.load %arg7[%c0_17, %c0_18] : memref<1x64xf32, #tpu.memory_space<vmem>>, vector<1x64xf32>
    %34 = vector.broadcast %33 : vector<1x64xf32> to vector<16x64xf32>
    %35 = arith.addf %32, %34 : vector<16x64xf32>
    %36 = arith.truncf %30 : vector<16x32xf32> to vector<16x32xbf16>
    %c0_19 = arith.constant 0 : index
    %c0_20 = arith.constant 0 : index
    %37 = vector.load %arg8[%c0_19, %c0_20] : memref<16x32xbf16, #tpu.memory_space<vmem>>, vector<16x32xbf16>
    tpu.vector_store %arg8[%c0_19, %c0_20], %36 {strides = array<i32>} : memref<16x32xbf16, #tpu.memory_space<vmem>>, vector<16x32xbf16>,
    %38 = arith.truncf %35 : vector<16x64xf32> to vector<16x64xbf16>
    %c0_21 = arith.constant 0 : index
    %c0_22 = arith.constant 0 : index
    %39 = vector.load %arg9[%c0_21, %c0_22] : memref<16x64xbf16, #tpu.memory_space<vmem>>, vector<16x64xbf16>
    tpu.vector_store %arg9[%c0_21, %c0_22], %38 {strides = array<i32>} : memref<16x64xbf16, #tpu.memory_space<vmem>>, vector<16x64xbf16>,
    return
  }
  func.func @transform_0(%arg0: i32) -> (i32, i32) {
    %c0_i32 = arith.constant 0 : i32
    %c0_i32_0 = arith.constant 0 : i32
    return %arg0, %c0_i32 : i32, i32
  }
  func.func @transform_1(%arg0: i32) -> (i32, i32) {
    %c0_i32 = arith.constant 0 : i32
    %c0_i32_0 = arith.constant 0 : i32
    %c0_i32_1 = arith.constant 0 : i32
    return %c0_i32, %c0_i32_0 : i32, i32
  }
  func.func @transform_2(%arg0: i32) -> (i32, i32) {
    %c0_i32 = arith.constant 0 : i32
    %c0_i32_0 = arith.constant 0 : i32
    %c0_i32_1 = arith.constant 0 : i32
    return %c0_i32, %c0_i32_0 : i32, i32
  }
  func.func @transform_3(%arg0: i32) -> (i32, i32) {
    %c0_i32 = arith.constant 0 : i32
    %c0_i32_0 = arith.constant 0 : i32
    %c0_i32_1 = arith.constant 0 : i32
    return %c0_i32, %c0_i32_0 : i32, i32
  }
  func.func @transform_4(%arg0: i32) -> (i32, i32) {
    %c0_i32 = arith.constant 0 : i32
    %c0_i32_0 = arith.constant 0 : i32
    %c0_i32_1 = arith.constant 0 : i32
    return %c0_i32, %c0_i32_0 : i32, i32
  }
  func.func @transform_5(%arg0: i32) -> (i32, i32) {
    %c0_i32 = arith.constant 0 : i32
    %c0_i32_0 = arith.constant 0 : i32
    %c0_i32_1 = arith.constant 0 : i32
    return %c0_i32, %c0_i32_0 : i32, i32
  }
  func.func @transform_6(%arg0: i32) -> (i32, i32) {
    %c0_i32 = arith.constant 0 : i32
    %c0_i32_0 = arith.constant 0 : i32
    %c0_i32_1 = arith.constant 0 : i32
    return %c0_i32, %c0_i32_0 : i32, i32
  }
  func.func @transform_7(%arg0: i32) -> (i32, i32) {
    %c0_i32 = arith.constant 0 : i32
    %c0_i32_0 = arith.constant 0 : i32
    return %arg0, %c0_i32 : i32, i32
  }
  func.func @transform_8(%arg0: i32) -> (i32, i32) {
    %c0_i32 = arith.constant 0 : i32
    %c0_i32_0 = arith.constant 0 : i32
    return %arg0, %c0_i32 : i32, i32
  }
}

module attributes {stable_mosaic.version = 11 : i64} {
  func.func @_ffn_kernel(%arg0: i32, %arg1: memref<16x32xf32, #tpu.memory_space<vmem>>, %arg2: memref<1x32xf32, #tpu.memory_space<vmem>>, %arg3: memref<1x32xf32, #tpu.memory_space<vmem>>, %arg4: memref<32x64xbf16, #tpu.memory_space<vmem>>, %arg5: memref<1x64xf32, #tpu.memory_space<vmem>>, %arg6: memref<64x32xbf16, #tpu.memory_space<vmem>>, %arg7: memref<1x32xf32, #tpu.memory_space<vmem>>, %arg8: memref<1x32xf32, #tpu.memory_space<vmem>>, %arg9: memref<1x32xf32, #tpu.memory_space<vmem>>, %arg10: memref<16x32xf32, #tpu.memory_space<vmem>>) attributes {dimension_semantics = [#tpu.dimension_semantics<parallel>], iteration_bounds = array<i64: 1>, scalar_prefetch = 0 : i64, scratch_operands = 0 : i64, tpu.core_type = #tpu.core_type<tc>, window_params = [{transform_indices = @transform_0, window_bounds = array<i64: 16, 32>}, {pipeline_mode = #tpu.pipeline_mode<synchronous>, transform_indices = @transform_1, window_bounds = array<i64: 1, 32>}, {pipeline_mode = #tpu.pipeline_mode<synchronous>, transform_indices = @transform_2, window_bounds = array<i64: 1, 32>}, {pipeline_mode = #tpu.pipeline_mode<synchronous>, transform_indices = @transform_3, window_bounds = array<i64: 32, 64>}, {pipeline_mode = #tpu.pipeline_mode<synchronous>, transform_indices = @transform_4, window_bounds = array<i64: 1, 64>}, {pipeline_mode = #tpu.pipeline_mode<synchronous>, transform_indices = @transform_5, window_bounds = array<i64: 64, 32>}, {pipeline_mode = #tpu.pipeline_mode<synchronous>, transform_indices = @transform_6, window_bounds = array<i64: 1, 32>}, {pipeline_mode = #tpu.pipeline_mode<synchronous>, transform_indices = @transform_7, window_bounds = array<i64: 1, 32>}, {pipeline_mode = #tpu.pipeline_mode<synchronous>, transform_indices = @transform_8, window_bounds = array<i64: 1, 32>}, {transform_indices = @transform_9, window_bounds = array<i64: 16, 32>}]} {
    %c0 = arith.constant 0 : index
    %c0_0 = arith.constant 0 : index
    %0 = vector.load %arg1[%c0, %c0_0] : memref<16x32xf32, #tpu.memory_space<vmem>>, vector<16x32xf32>
    %c0_1 = arith.constant 0 : index
    %c0_2 = arith.constant 0 : index
    %1 = vector.load %arg2[%c0_1, %c0_2] : memref<1x32xf32, #tpu.memory_space<vmem>>, vector<1x32xf32>
    %c0_3 = arith.constant 0 : index
    %c0_4 = arith.constant 0 : index
    %2 = vector.load %arg3[%c0_3, %c0_4] : memref<1x32xf32, #tpu.memory_space<vmem>>, vector<1x32xf32>
    %cst = arith.constant dense<0.000000e+00> : vector<16xf32>
    %3 = vector.multi_reduction <add>, %0, %cst [1] : vector<16x32xf32> to vector<16xf32>
    %4 = vector.shape_cast %3 : vector<16xf32> to vector<16x1xf32>
    %cst_5 = arith.constant 3.200000e+01 : f32
    %5 = vector.broadcast %cst_5 : f32 to vector<16x1xf32>
    %6 = arith.divf %4, %5 : vector<16x1xf32>
    %7 = vector.broadcast %6 : vector<16x1xf32> to vector<16x32xf32>
    %8 = arith.subf %0, %7 : vector<16x32xf32>
    %9 = arith.mulf %8, %8 : vector<16x32xf32>
    %cst_6 = arith.constant dense<0.000000e+00> : vector<16xf32>
    %10 = vector.multi_reduction <add>, %9, %cst_6 [1] : vector<16x32xf32> to vector<16xf32>
    %11 = vector.shape_cast %10 : vector<16xf32> to vector<16x1xf32>
    %cst_7 = arith.constant 3.200000e+01 : f32
    %12 = vector.broadcast %cst_7 : f32 to vector<16x1xf32>
    %13 = arith.divf %11, %12 : vector<16x1xf32>
    %14 = vector.broadcast %6 : vector<16x1xf32> to vector<16x32xf32>
    %15 = arith.subf %0, %14 : vector<16x32xf32>
    %cst_8 = arith.constant 9.99999974E-6 : f32
    %16 = vector.broadcast %cst_8 : f32 to vector<16x1xf32>
    %17 = arith.addf %13, %16 : vector<16x1xf32>
    %18 = math.rsqrt %17 : vector<16x1xf32>
    %19 = vector.broadcast %18 : vector<16x1xf32> to vector<16x32xf32>
    %20 = arith.mulf %15, %19 : vector<16x32xf32>
    %21 = vector.broadcast %1 : vector<1x32xf32> to vector<16x32xf32>
    %22 = arith.mulf %20, %21 : vector<16x32xf32>
    %23 = vector.broadcast %2 : vector<1x32xf32> to vector<16x32xf32>
    %24 = arith.addf %22, %23 : vector<16x32xf32>
    %25 = arith.truncf %24 : vector<16x32xf32> to vector<16x32xbf16>
    %c0_9 = arith.constant 0 : index
    %c0_10 = arith.constant 0 : index
    %26 = vector.load %arg4[%c0_9, %c0_10] : memref<32x64xbf16, #tpu.memory_space<vmem>>, vector<32x64xbf16>
    %cst_11 = arith.constant dense<0.000000e+00> : vector<16x64xf32>
    %27 = tpu.matmul %25, %26, %cst_11 {dimension_numbers = #tpu.dot_dimension_numbers<[1], [0], [0], [1], [0, 0, 1, 1], [], []>} : vector<16x32xbf16>, vector<32x64xbf16>, vector<16x64xf32> -> vector<16x64xf32>
    %c0_12 = arith.constant 0 : index
    %c0_13 = arith.constant 0 : index
    %28 = vector.load %arg5[%c0_12, %c0_13] : memref<1x64xf32, #tpu.memory_space<vmem>>, vector<1x64xf32>
    %29 = vector.broadcast %28 : vector<1x64xf32> to vector<16x64xf32>
    %30 = arith.addf %27, %29 : vector<16x64xf32>
    %31 = arith.negf %30 : vector<16x64xf32>
    %32 = math.exp %31 : vector<16x64xf32>
    %cst_14 = arith.constant 1.000000e+00 : f32
    %33 = vector.broadcast %cst_14 : f32 to vector<16x64xf32>
    %34 = arith.addf %33, %32 : vector<16x64xf32>
    %35 = arith.divf %33, %34 : vector<16x64xf32>
    %36 = arith.mulf %30, %35 : vector<16x64xf32>
    %37 = arith.truncf %36 : vector<16x64xf32> to vector<16x64xbf16>
    %c0_15 = arith.constant 0 : index
    %c0_16 = arith.constant 0 : index
    %38 = vector.load %arg6[%c0_15, %c0_16] : memref<64x32xbf16, #tpu.memory_space<vmem>>, vector<64x32xbf16>
    %cst_17 = arith.constant dense<0.000000e+00> : vector<16x32xf32>
    %39 = tpu.matmul %37, %38, %cst_17 {dimension_numbers = #tpu.dot_dimension_numbers<[1], [0], [0], [1], [0, 0, 1, 1], [], []>} : vector<16x64xbf16>, vector<64x32xbf16>, vector<16x32xf32> -> vector<16x32xf32>
    %c0_18 = arith.constant 0 : index
    %c0_19 = arith.constant 0 : index
    %40 = vector.load %arg7[%c0_18, %c0_19] : memref<1x32xf32, #tpu.memory_space<vmem>>, vector<1x32xf32>
    %41 = vector.broadcast %40 : vector<1x32xf32> to vector<16x32xf32>
    %42 = arith.addf %39, %41 : vector<16x32xf32>
    %cst_20 = arith.constant 5.000000e-01 : f32
    %43 = vector.broadcast %cst_20 : f32 to vector<16x32xf32>
    %44 = arith.mulf %43, %42 : vector<16x32xf32>
    %45 = arith.addf %0, %44 : vector<16x32xf32>
    %c0_21 = arith.constant 0 : index
    %c0_22 = arith.constant 0 : index
    %46 = vector.load %arg10[%c0_21, %c0_22] : memref<16x32xf32, #tpu.memory_space<vmem>>, vector<16x32xf32>
    tpu.vector_store %arg10[%c0_21, %c0_22], %45 {strides = array<i32>} : memref<16x32xf32, #tpu.memory_space<vmem>>, vector<16x32xf32>,
    return
  }
  func.func @transform_0(%arg0: i32) -> (i32, i32) {
    %c0_i32 = arith.constant 0 : i32
    %c0_i32_0 = arith.constant 0 : i32
    return %arg0, %c0_i32 : i32, i32
  }
  func.func @transform_1(%arg0: i32) -> (i32, i32) {
    %c0_i32 = arith.constant 0 : i32
    %c0_i32_0 = arith.constant 0 : i32
    %c0_i32_1 = arith.constant 0 : i32
    return %c0_i32, %c0_i32_0 : i32, i32
  }
  func.func @transform_2(%arg0: i32) -> (i32, i32) {
    %c0_i32 = arith.constant 0 : i32
    %c0_i32_0 = arith.constant 0 : i32
    %c0_i32_1 = arith.constant 0 : i32
    return %c0_i32, %c0_i32_0 : i32, i32
  }
  func.func @transform_3(%arg0: i32) -> (i32, i32) {
    %c0_i32 = arith.constant 0 : i32
    %c0_i32_0 = arith.constant 0 : i32
    %c0_i32_1 = arith.constant 0 : i32
    return %c0_i32, %c0_i32_0 : i32, i32
  }
  func.func @transform_4(%arg0: i32) -> (i32, i32) {
    %c0_i32 = arith.constant 0 : i32
    %c0_i32_0 = arith.constant 0 : i32
    %c0_i32_1 = arith.constant 0 : i32
    return %c0_i32, %c0_i32_0 : i32, i32
  }
  func.func @transform_5(%arg0: i32) -> (i32, i32) {
    %c0_i32 = arith.constant 0 : i32
    %c0_i32_0 = arith.constant 0 : i32
    %c0_i32_1 = arith.constant 0 : i32
    return %c0_i32, %c0_i32_0 : i32, i32
  }
  func.func @transform_6(%arg0: i32) -> (i32, i32) {
    %c0_i32 = arith.constant 0 : i32
    %c0_i32_0 = arith.constant 0 : i32
    %c0_i32_1 = arith.constant 0 : i32
    return %c0_i32, %c0_i32_0 : i32, i32
  }
  func.func @transform_7(%arg0: i32) -> (i32, i32) {
    %c0_i32 = arith.constant 0 : i32
    %c0_i32_0 = arith.constant 0 : i32
    %c0_i32_1 = arith.constant 0 : i32
    return %c0_i32, %c0_i32_0 : i32, i32
  }
  func.func @transform_8(%arg0: i32) -> (i32, i32) {
    %c0_i32 = arith.constant 0 : i32
    %c0_i32_0 = arith.constant 0 : i32
    %c0_i32_1 = arith.constant 0 : i32
    return %c0_i32, %c0_i32_0 : i32, i32
  }
  func.func @transform_9(%arg0: i32) -> (i32, i32) {
    %c0_i32 = arith.constant 0 : i32
    %c0_i32_0 = arith.constant 0 : i32
    return %arg0, %c0_i32 : i32, i32
  }
}

module attributes {stable_mosaic.version = 11 : i64} {
  func.func @_linear_kernel(%arg0: i32, %arg1: memref<16x32xf32, #tpu.memory_space<vmem>>, %arg2: memref<32x32xbf16, #tpu.memory_space<vmem>>, %arg3: memref<1x32xf32, #tpu.memory_space<vmem>>, %arg4: memref<16x32xbf16, #tpu.memory_space<vmem>>) attributes {dimension_semantics = [#tpu.dimension_semantics<parallel>], iteration_bounds = array<i64: 1>, scalar_prefetch = 0 : i64, scratch_operands = 0 : i64, tpu.core_type = #tpu.core_type<tc>, window_params = [{transform_indices = @transform_0, window_bounds = array<i64: 16, 32>}, {pipeline_mode = #tpu.pipeline_mode<synchronous>, transform_indices = @transform_1, window_bounds = array<i64: 32, 32>}, {pipeline_mode = #tpu.pipeline_mode<synchronous>, transform_indices = @transform_2, window_bounds = array<i64: 1, 32>}, {transform_indices = @transform_3, window_bounds = array<i64: 16, 32>}]} {
    %c0 = arith.constant 0 : index
    %c0_0 = arith.constant 0 : index
    %0 = vector.load %arg1[%c0, %c0_0] : memref<16x32xf32, #tpu.memory_space<vmem>>, vector<16x32xf32>
    %1 = arith.truncf %0 : vector<16x32xf32> to vector<16x32xbf16>
    %c0_1 = arith.constant 0 : index
    %c0_2 = arith.constant 0 : index
    %2 = vector.load %arg2[%c0_1, %c0_2] : memref<32x32xbf16, #tpu.memory_space<vmem>>, vector<32x32xbf16>
    %cst = arith.constant dense<0.000000e+00> : vector<16x32xf32>
    %3 = tpu.matmul %1, %2, %cst {dimension_numbers = #tpu.dot_dimension_numbers<[1], [0], [0], [1], [0, 0, 1, 1], [], []>} : vector<16x32xbf16>, vector<32x32xbf16>, vector<16x32xf32> -> vector<16x32xf32>
    %c0_3 = arith.constant 0 : index
    %c0_4 = arith.constant 0 : index
    %4 = vector.load %arg3[%c0_3, %c0_4] : memref<1x32xf32, #tpu.memory_space<vmem>>, vector<1x32xf32>
    %5 = vector.broadcast %4 : vector<1x32xf32> to vector<16x32xf32>
    %6 = arith.addf %3, %5 : vector<16x32xf32>
    %7 = arith.truncf %6 : vector<16x32xf32> to vector<16x32xbf16>
    %c0_5 = arith.constant 0 : index
    %c0_6 = arith.constant 0 : index
    %8 = vector.load %arg4[%c0_5, %c0_6] : memref<16x32xbf16, #tpu.memory_space<vmem>>, vector<16x32xbf16>
    tpu.vector_store %arg4[%c0_5, %c0_6], %7 {strides = array<i32>} : memref<16x32xbf16, #tpu.memory_space<vmem>>, vector<16x32xbf16>,
    return
  }
  func.func @transform_0(%arg0: i32) -> (i32, i32) {
    %c0_i32 = arith.constant 0 : i32
    %c0_i32_0 = arith.constant 0 : i32
    return %arg0, %c0_i32 : i32, i32
  }
  func.func @transform_1(%arg0: i32) -> (i32, i32) {
    %c0_i32 = arith.constant 0 : i32
    %c0_i32_0 = arith.constant 0 : i32
    %c0_i32_1 = arith.constant 0 : i32
    return %c0_i32, %c0_i32_0 : i32, i32
  }
  func.func @transform_2(%arg0: i32) -> (i32, i32) {
    %c0_i32 = arith.constant 0 : i32
    %c0_i32_0 = arith.constant 0 : i32
    %c0_i32_1 = arith.constant 0 : i32
    return %c0_i32, %c0_i32_0 : i32, i32
  }
  func.func @transform_3(%arg0: i32) -> (i32, i32) {
    %c0_i32 = arith.constant 0 : i32
    %c0_i32_0 = arith.constant 0 : i32
    return %arg0, %c0_i32 : i32, i32
  }
}

module attributes {stable_mosaic.version = 11 : i64} {
  func.func @_conv_block_kernel(%arg0: i32, %arg1: memref<1x8x32xf32, #tpu.memory_space<vmem>>, %arg2: memref<1x32xf32, #tpu.memory_space<vmem>>, %arg3: memref<1x32xf32, #tpu.memory_space<vmem>>, %arg4: memref<32x64xbf16, #tpu.memory_space<vmem>>, %arg5: memref<1x64xf32, #tpu.memory_space<vmem>>, %arg6: memref<5x32xf32, #tpu.memory_space<vmem>>, %arg7: memref<1x32xf32, #tpu.memory_space<vmem>>, %arg8: memref<1x32xf32, #tpu.memory_space<vmem>>, %arg9: memref<1x32xf32, #tpu.memory_space<vmem>>, %arg10: memref<32x32xbf16, #tpu.memory_space<vmem>>, %arg11: memref<1x32xf32, #tpu.memory_space<vmem>>, %arg12: memref<1x8x32xf32, #tpu.memory_space<vmem>>) attributes {dimension_semantics = [#tpu.dimension_semantics<parallel>], iteration_bounds = array<i64: 2>, scalar_prefetch = 0 : i64, scratch_operands = 0 : i64, tpu.core_type = #tpu.core_type<tc>, window_params = [{transform_indices = @transform_0, window_bounds = array<i64: 1, 8, 32>}, {pipeline_mode = #tpu.pipeline_mode<synchronous>, transform_indices = @transform_1, window_bounds = array<i64: 1, 32>}, {pipeline_mode = #tpu.pipeline_mode<synchronous>, transform_indices = @transform_2, window_bounds = array<i64: 1, 32>}, {pipeline_mode = #tpu.pipeline_mode<synchronous>, transform_indices = @transform_3, window_bounds = array<i64: 32, 64>}, {pipeline_mode = #tpu.pipeline_mode<synchronous>, transform_indices = @transform_4, window_bounds = array<i64: 1, 64>}, {pipeline_mode = #tpu.pipeline_mode<synchronous>, transform_indices = @transform_5, window_bounds = array<i64: 5, 32>}, {pipeline_mode = #tpu.pipeline_mode<synchronous>, transform_indices = @transform_6, window_bounds = array<i64: 1, 32>}, {pipeline_mode = #tpu.pipeline_mode<synchronous>, transform_indices = @transform_7, window_bounds = array<i64: 1, 32>}, {pipeline_mode = #tpu.pipeline_mode<synchronous>, transform_indices = @transform_8, window_bounds = array<i64: 1, 32>}, {pipeline_mode = #tpu.pipeline_mode<synchronous>, transform_indices = @transform_9, window_bounds = array<i64: 32, 32>}, {pipeline_mode = #tpu.pipeline_mode<synchronous>, transform_indices = @transform_10, window_bounds = array<i64: 1, 32>}, {transform_indices = @transform_11, window_bounds = array<i64: 1, 8, 32>}]} {
    %c0 = arith.constant 0 : index
    %c0_0 = arith.constant 0 : index
    %c0_1 = arith.constant 0 : index
    %0 = vector.load %arg1[%c0, %c0_0, %c0_1] : memref<1x8x32xf32, #tpu.memory_space<vmem>>, vector<1x8x32xf32>
    %1 = vector.shape_cast %0 : vector<1x8x32xf32> to vector<8x32xf32>
    %c0_2 = arith.constant 0 : index
    %c0_3 = arith.constant 0 : index
    %2 = vector.load %arg2[%c0_2, %c0_3] : memref<1x32xf32, #tpu.memory_space<vmem>>, vector<1x32xf32>
    %c0_4 = arith.constant 0 : index
    %c0_5 = arith.constant 0 : index
    %3 = vector.load %arg3[%c0_4, %c0_5] : memref<1x32xf32, #tpu.memory_space<vmem>>, vector<1x32xf32>
    %cst = arith.constant dense<0.000000e+00> : vector<8xf32>
    %4 = vector.multi_reduction <add>, %1, %cst [1] : vector<8x32xf32> to vector<8xf32>
    %5 = vector.shape_cast %4 : vector<8xf32> to vector<8x1xf32>
    %cst_6 = arith.constant 3.200000e+01 : f32
    %6 = vector.broadcast %cst_6 : f32 to vector<8x1xf32>
    %7 = arith.divf %5, %6 : vector<8x1xf32>
    %8 = vector.broadcast %7 : vector<8x1xf32> to vector<8x32xf32>
    %9 = arith.subf %1, %8 : vector<8x32xf32>
    %10 = arith.mulf %9, %9 : vector<8x32xf32>
    %cst_7 = arith.constant dense<0.000000e+00> : vector<8xf32>
    %11 = vector.multi_reduction <add>, %10, %cst_7 [1] : vector<8x32xf32> to vector<8xf32>
    %12 = vector.shape_cast %11 : vector<8xf32> to vector<8x1xf32>
    %cst_8 = arith.constant 3.200000e+01 : f32
    %13 = vector.broadcast %cst_8 : f32 to vector<8x1xf32>
    %14 = arith.divf %12, %13 : vector<8x1xf32>
    %15 = vector.broadcast %7 : vector<8x1xf32> to vector<8x32xf32>
    %16 = arith.subf %1, %15 : vector<8x32xf32>
    %cst_9 = arith.constant 9.99999974E-6 : f32
    %17 = vector.broadcast %cst_9 : f32 to vector<8x1xf32>
    %18 = arith.addf %14, %17 : vector<8x1xf32>
    %19 = math.rsqrt %18 : vector<8x1xf32>
    %20 = vector.broadcast %19 : vector<8x1xf32> to vector<8x32xf32>
    %21 = arith.mulf %16, %20 : vector<8x32xf32>
    %22 = vector.broadcast %2 : vector<1x32xf32> to vector<8x32xf32>
    %23 = arith.mulf %21, %22 : vector<8x32xf32>
    %24 = vector.broadcast %3 : vector<1x32xf32> to vector<8x32xf32>
    %25 = arith.addf %23, %24 : vector<8x32xf32>
    %26 = arith.truncf %25 : vector<8x32xf32> to vector<8x32xbf16>
    %c0_10 = arith.constant 0 : index
    %c0_11 = arith.constant 0 : index
    %27 = vector.load %arg4[%c0_10, %c0_11] : memref<32x64xbf16, #tpu.memory_space<vmem>>, vector<32x64xbf16>
    %cst_12 = arith.constant dense<0.000000e+00> : vector<8x64xf32>
    %28 = tpu.matmul %26, %27, %cst_12 {dimension_numbers = #tpu.dot_dimension_numbers<[1], [0], [0], [1], [0, 0, 1, 1], [], []>} : vector<8x32xbf16>, vector<32x64xbf16>, vector<8x64xf32> -> vector<8x64xf32>
    %c0_13 = arith.constant 0 : index
    %c0_14 = arith.constant 0 : index
    %29 = vector.load %arg5[%c0_13, %c0_14] : memref<1x64xf32, #tpu.memory_space<vmem>>, vector<1x64xf32>
    %30 = vector.broadcast %29 : vector<1x64xf32> to vector<8x64xf32>
    %31 = arith.addf %28, %30 : vector<8x64xf32>
    %32 = vector.extract_strided_slice %31 {offsets = [0, 0], sizes = [8, 32], strides = [1, 1]} : vector<8x64xf32> to vector<8x32xf32>
    %33 = vector.extract_strided_slice %31 {offsets = [0, 32], sizes = [8, 32], strides = [1, 1]} : vector<8x64xf32> to vector<8x32xf32>
    %34 = arith.negf %33 : vector<8x32xf32>
    %35 = math.exp %34 : vector<8x32xf32>
    %cst_15 = arith.constant 1.000000e+00 : f32
    %36 = vector.broadcast %cst_15 : f32 to vector<8x32xf32>
    %37 = arith.addf %36, %35 : vector<8x32xf32>
    %38 = arith.divf %36, %37 : vector<8x32xf32>
    %39 = arith.mulf %32, %38 : vector<8x32xf32>
    %40 = tpu.iota {dimensions = array<i32: 0>} : vector<8x32xi32>
    %cst_16 = arith.constant 0.000000e+00 : f32
    %41 = vector.broadcast %cst_16 : f32 to vector<8x32xf32>
    %c2_i32 = arith.constant 2 : i32
    %42 = tpu.dynamic_rotate %39 by %c2_i32 dim 0 : vector<8x32xf32>, i32 -> vector<8x32xf32>
    %c-2_i32 = arith.constant -2 : i32
    %43 = vector.broadcast %c-2_i32 : i32 to vector<8x32xi32>
    %44 = arith.addi %40, %43 : vector<8x32xi32>
    %c0_i32 = arith.constant 0 : i32
    %45 = vector.broadcast %c0_i32 : i32 to vector<8x32xi32>
    %46 = arith.cmpi sge, %44, %45 : vector<8x32xi32>
    %c-2_i32_17 = arith.constant -2 : i32
    %47 = vector.broadcast %c-2_i32_17 : i32 to vector<8x32xi32>
    %48 = arith.addi %40, %47 : vector<8x32xi32>
    %c8_i32 = arith.constant 8 : i32
    %49 = vector.broadcast %c8_i32 : i32 to vector<8x32xi32>
    %50 = arith.cmpi slt, %48, %49 : vector<8x32xi32>
    %51 = arith.andi %46, %50 : vector<8x32xi1>
    %cst_18 = arith.constant 0.000000e+00 : f32
    %52 = vector.broadcast %cst_18 : f32 to vector<8x32xf32>
    %53 = arith.select %51, %42, %52 : vector<8x32xi1>, vector<8x32xf32>
    %c0_19 = arith.constant 0 : index
    %c0_20 = arith.constant 0 : index
    %54 = vector.load %arg6[%c0_19, %c0_20] : memref<5x32xf32, #tpu.memory_space<vmem>>, vector<1x32xf32>
    %55 = vector.broadcast %54 : vector<1x32xf32> to vector<8x32xf32>
    %56 = arith.mulf %53, %55 : vector<8x32xf32>
    %57 = arith.addf %41, %56 : vector<8x32xf32>
    %c1_i32 = arith.constant 1 : i32
    %58 = tpu.dynamic_rotate %39 by %c1_i32 dim 0 : vector<8x32xf32>, i32 -> vector<8x32xf32>
    %c-1_i32 = arith.constant -1 : i32
    %59 = vector.broadcast %c-1_i32 : i32 to vector<8x32xi32>
    %60 = arith.addi %40, %59 : vector<8x32xi32>
    %c0_i32_21 = arith.constant 0 : i32
    %61 = vector.broadcast %c0_i32_21 : i32 to vector<8x32xi32>
    %62 = arith.cmpi sge, %60, %61 : vector<8x32xi32>
    %c-1_i32_22 = arith.constant -1 : i32
    %63 = vector.broadcast %c-1_i32_22 : i32 to vector<8x32xi32>
    %64 = arith.addi %40, %63 : vector<8x32xi32>
    %c8_i32_23 = arith.constant 8 : i32
    %65 = vector.broadcast %c8_i32_23 : i32 to vector<8x32xi32>
    %66 = arith.cmpi slt, %64, %65 : vector<8x32xi32>
    %67 = arith.andi %62, %66 : vector<8x32xi1>
    %cst_24 = arith.constant 0.000000e+00 : f32
    %68 = vector.broadcast %cst_24 : f32 to vector<8x32xf32>
    %69 = arith.select %67, %58, %68 : vector<8x32xi1>, vector<8x32xf32>
    %c1 = arith.constant 1 : index
    %c0_25 = arith.constant 0 : index
    %70 = vector.load %arg6[%c1, %c0_25] : memref<5x32xf32, #tpu.memory_space<vmem>>, vector<1x32xf32>
    %71 = vector.broadcast %70 : vector<1x32xf32> to vector<8x32xf32>
    %72 = arith.mulf %69, %71 : vector<8x32xf32>
    %73 = arith.addf %57, %72 : vector<8x32xf32>
    %c2 = arith.constant 2 : index
    %c0_26 = arith.constant 0 : index
    %74 = vector.load %arg6[%c2, %c0_26] : memref<5x32xf32, #tpu.memory_space<vmem>>, vector<1x32xf32>
    %75 = vector.broadcast %74 : vector<1x32xf32> to vector<8x32xf32>
    %76 = arith.mulf %39, %75 : vector<8x32xf32>
    %77 = arith.addf %73, %76 : vector<8x32xf32>
    %c7_i32 = arith.constant 7 : i32
    %78 = tpu.dynamic_rotate %39 by %c7_i32 dim 0 : vector<8x32xf32>, i32 -> vector<8x32xf32>
    %c1_i32_27 = arith.constant 1 : i32
    %79 = vector.broadcast %c1_i32_27 : i32 to vector<8x32xi32>
    %80 = arith.addi %40, %79 : vector<8x32xi32>
    %c0_i32_28 = arith.constant 0 : i32
    %81 = vector.broadcast %c0_i32_28 : i32 to vector<8x32xi32>
    %82 = arith.cmpi sge, %80, %81 : vector<8x32xi32>
    %c1_i32_29 = arith.constant 1 : i32
    %83 = vector.broadcast %c1_i32_29 : i32 to vector<8x32xi32>
    %84 = arith.addi %40, %83 : vector<8x32xi32>
    %c8_i32_30 = arith.constant 8 : i32
    %85 = vector.broadcast %c8_i32_30 : i32 to vector<8x32xi32>
    %86 = arith.cmpi slt, %84, %85 : vector<8x32xi32>
    %87 = arith.andi %82, %86 : vector<8x32xi1>
    %cst_31 = arith.constant 0.000000e+00 : f32
    %88 = vector.broadcast %cst_31 : f32 to vector<8x32xf32>
    %89 = arith.select %87, %78, %88 : vector<8x32xi1>, vector<8x32xf32>
    %c3 = arith.constant 3 : index
    %c0_32 = arith.constant 0 : index
    %90 = vector.load %arg6[%c3, %c0_32] : memref<5x32xf32, #tpu.memory_space<vmem>>, vector<1x32xf32>
    %91 = vector.broadcast %90 : vector<1x32xf32> to vector<8x32xf32>
    %92 = arith.mulf %89, %91 : vector<8x32xf32>
    %93 = arith.addf %77, %92 : vector<8x32xf32>
    %c6_i32 = arith.constant 6 : i32
    %94 = tpu.dynamic_rotate %39 by %c6_i32 dim 0 : vector<8x32xf32>, i32 -> vector<8x32xf32>
    %c2_i32_33 = arith.constant 2 : i32
    %95 = vector.broadcast %c2_i32_33 : i32 to vector<8x32xi32>
    %96 = arith.addi %40, %95 : vector<8x32xi32>
    %c0_i32_34 = arith.constant 0 : i32
    %97 = vector.broadcast %c0_i32_34 : i32 to vector<8x32xi32>
    %98 = arith.cmpi sge, %96, %97 : vector<8x32xi32>
    %c2_i32_35 = arith.constant 2 : i32
    %99 = vector.broadcast %c2_i32_35 : i32 to vector<8x32xi32>
    %100 = arith.addi %40, %99 : vector<8x32xi32>
    %c8_i32_36 = arith.constant 8 : i32
    %101 = vector.broadcast %c8_i32_36 : i32 to vector<8x32xi32>
    %102 = arith.cmpi slt, %100, %101 : vector<8x32xi32>
    %103 = arith.andi %98, %102 : vector<8x32xi1>
    %cst_37 = arith.constant 0.000000e+00 : f32
    %104 = vector.broadcast %cst_37 : f32 to vector<8x32xf32>
    %105 = arith.select %103, %94, %104 : vector<8x32xi1>, vector<8x32xf32>
    %c4 = arith.constant 4 : index
    %c0_38 = arith.constant 0 : index
    %106 = vector.load %arg6[%c4, %c0_38] : memref<5x32xf32, #tpu.memory_space<vmem>>, vector<1x32xf32>
    %107 = vector.broadcast %106 : vector<1x32xf32> to vector<8x32xf32>
    %108 = arith.mulf %105, %107 : vector<8x32xf32>
    %109 = arith.addf %93, %108 : vector<8x32xf32>
    %c0_39 = arith.constant 0 : index
    %c0_40 = arith.constant 0 : index
    %110 = vector.load %arg7[%c0_39, %c0_40] : memref<1x32xf32, #tpu.memory_space<vmem>>, vector<1x32xf32>
    %111 = vector.broadcast %110 : vector<1x32xf32> to vector<8x32xf32>
    %112 = arith.addf %109, %111 : vector<8x32xf32>
    %c0_41 = arith.constant 0 : index
    %c0_42 = arith.constant 0 : index
    %113 = vector.load %arg8[%c0_41, %c0_42] : memref<1x32xf32, #tpu.memory_space<vmem>>, vector<1x32xf32>
    %c0_43 = arith.constant 0 : index
    %c0_44 = arith.constant 0 : index
    %114 = vector.load %arg9[%c0_43, %c0_44] : memref<1x32xf32, #tpu.memory_space<vmem>>, vector<1x32xf32>
    %cst_45 = arith.constant dense<0.000000e+00> : vector<8xf32>
    %115 = vector.multi_reduction <add>, %112, %cst_45 [1] : vector<8x32xf32> to vector<8xf32>
    %116 = vector.shape_cast %115 : vector<8xf32> to vector<8x1xf32>
    %cst_46 = arith.constant 3.200000e+01 : f32
    %117 = vector.broadcast %cst_46 : f32 to vector<8x1xf32>
    %118 = arith.divf %116, %117 : vector<8x1xf32>
    %119 = vector.broadcast %118 : vector<8x1xf32> to vector<8x32xf32>
    %120 = arith.subf %112, %119 : vector<8x32xf32>
    %121 = arith.mulf %120, %120 : vector<8x32xf32>
    %cst_47 = arith.constant dense<0.000000e+00> : vector<8xf32>
    %122 = vector.multi_reduction <add>, %121, %cst_47 [1] : vector<8x32xf32> to vector<8xf32>
    %123 = vector.shape_cast %122 : vector<8xf32> to vector<8x1xf32>
    %cst_48 = arith.constant 3.200000e+01 : f32
    %124 = vector.broadcast %cst_48 : f32 to vector<8x1xf32>
    %125 = arith.divf %123, %124 : vector<8x1xf32>
    %126 = vector.broadcast %118 : vector<8x1xf32> to vector<8x32xf32>
    %127 = arith.subf %112, %126 : vector<8x32xf32>
    %cst_49 = arith.constant 9.99999974E-6 : f32
    %128 = vector.broadcast %cst_49 : f32 to vector<8x1xf32>
    %129 = arith.addf %125, %128 : vector<8x1xf32>
    %130 = math.rsqrt %129 : vector<8x1xf32>
    %131 = vector.broadcast %130 : vector<8x1xf32> to vector<8x32xf32>
    %132 = arith.mulf %127, %131 : vector<8x32xf32>
    %133 = vector.broadcast %113 : vector<1x32xf32> to vector<8x32xf32>
    %134 = arith.mulf %132, %133 : vector<8x32xf32>
    %135 = vector.broadcast %114 : vector<1x32xf32> to vector<8x32xf32>
    %136 = arith.addf %134, %135 : vector<8x32xf32>
    %137 = arith.negf %136 : vector<8x32xf32>
    %138 = math.exp %137 : vector<8x32xf32>
    %cst_50 = arith.constant 1.000000e+00 : f32
    %139 = vector.broadcast %cst_50 : f32 to vector<8x32xf32>
    %140 = arith.addf %139, %138 : vector<8x32xf32>
    %141 = arith.divf %139, %140 : vector<8x32xf32>
    %142 = arith.mulf %136, %141 : vector<8x32xf32>
    %143 = arith.truncf %142 : vector<8x32xf32> to vector<8x32xbf16>
    %c0_51 = arith.constant 0 : index
    %c0_52 = arith.constant 0 : index
    %144 = vector.load %arg10[%c0_51, %c0_52] : memref<32x32xbf16, #tpu.memory_space<vmem>>, vector<32x32xbf16>
    %cst_53 = arith.constant dense<0.000000e+00> : vector<8x32xf32>
    %145 = tpu.matmul %143, %144, %cst_53 {dimension_numbers = #tpu.dot_dimension_numbers<[1], [0], [0], [1], [0, 0, 1, 1], [], []>} : vector<8x32xbf16>, vector<32x32xbf16>, vector<8x32xf32> -> vector<8x32xf32>
    %c0_54 = arith.constant 0 : index
    %c0_55 = arith.constant 0 : index
    %146 = vector.load %arg11[%c0_54, %c0_55] : memref<1x32xf32, #tpu.memory_space<vmem>>, vector<1x32xf32>
    %147 = vector.broadcast %146 : vector<1x32xf32> to vector<8x32xf32>
    %148 = arith.addf %145, %147 : vector<8x32xf32>
    %149 = arith.addf %1, %148 : vector<8x32xf32>
    %c0_56 = arith.constant 0 : index
    %c0_57 = arith.constant 0 : index
    %c0_58 = arith.constant 0 : index
    %150 = vector.load %arg12[%c0_56, %c0_57, %c0_58] : memref<1x8x32xf32, #tpu.memory_space<vmem>>, vector<1x8x32xf32>
    %151 = vector.shape_cast %150 : vector<1x8x32xf32> to vector<8x32xf32>
    %152 = vector.shape_cast %149 : vector<8x32xf32> to vector<1x8x32xf32>
    tpu.vector_store %arg12[%c0_56, %c0_57, %c0_58], %152 {strides = array<i32>} : memref<1x8x32xf32, #tpu.memory_space<vmem>>, vector<1x8x32xf32>,
    return
  }
  func.func @transform_0(%arg0: i32) -> (i32, i32, i32) {
    %c0_i32 = arith.constant 0 : i32
    %c0_i32_0 = arith.constant 0 : i32
    %c0_i32_1 = arith.constant 0 : i32
    return %arg0, %c0_i32, %c0_i32_0 : i32, i32, i32
  }
  func.func @transform_1(%arg0: i32) -> (i32, i32) {
    %c0_i32 = arith.constant 0 : i32
    %c0_i32_0 = arith.constant 0 : i32
    %c0_i32_1 = arith.constant 0 : i32
    return %c0_i32, %c0_i32_0 : i32, i32
  }
  func.func @transform_2(%arg0: i32) -> (i32, i32) {
    %c0_i32 = arith.constant 0 : i32
    %c0_i32_0 = arith.constant 0 : i32
    %c0_i32_1 = arith.constant 0 : i32
    return %c0_i32, %c0_i32_0 : i32, i32
  }
  func.func @transform_3(%arg0: i32) -> (i32, i32) {
    %c0_i32 = arith.constant 0 : i32
    %c0_i32_0 = arith.constant 0 : i32
    %c0_i32_1 = arith.constant 0 : i32
    return %c0_i32, %c0_i32_0 : i32, i32
  }
  func.func @transform_4(%arg0: i32) -> (i32, i32) {
    %c0_i32 = arith.constant 0 : i32
    %c0_i32_0 = arith.constant 0 : i32
    %c0_i32_1 = arith.constant 0 : i32
    return %c0_i32, %c0_i32_0 : i32, i32
  }
  func.func @transform_5(%arg0: i32) -> (i32, i32) {
    %c0_i32 = arith.constant 0 : i32
    %c0_i32_0 = arith.constant 0 : i32
    %c0_i32_1 = arith.constant 0 : i32
    return %c0_i32, %c0_i32_0 : i32, i32
  }
  func.func @transform_6(%arg0: i32) -> (i32, i32) {
    %c0_i32 = arith.constant 0 : i32
    %c0_i32_0 = arith.constant 0 : i32
    %c0_i32_1 = arith.constant 0 : i32
    return %c0_i32, %c0_i32_0 : i32, i32
  }
  func.func @transform_7(%arg0: i32) -> (i32, i32) {
    %c0_i32 = arith.constant 0 : i32
    %c0_i32_0 = arith.constant 0 : i32
    %c0_i32_1 = arith.constant 0 : i32
    return %c0_i32, %c0_i32_0 : i32, i32
  }
  func.func @transform_8(%arg0: i32) -> (i32, i32) {
    %c0_i32 = arith.constant 0 : i32
    %c0_i32_0 = arith.constant 0 : i32
    %c0_i32_1 = arith.constant 0 : i32
    return %c0_i32, %c0_i32_0 : i32, i32
  }
  func.func @transform_9(%arg0: i32) -> (i32, i32) {
    %c0_i32 = arith.constant 0 : i32
    %c0_i32_0 = arith.constant 0 : i32
    %c0_i32_1 = arith.constant 0 : i32
    return %c0_i32, %c0_i32_0 : i32, i32
  }
  func.func @transform_10(%arg0: i32) -> (i32, i32) {
    %c0_i32 = arith.constant 0 : i32
    %c0_i32_0 = arith.constant 0 : i32
    %c0_i32_1 = arith.constant 0 : i32
    return %c0_i32, %c0_i32_0 : i32, i32
  }
  func.func @transform_11(%arg0: i32) -> (i32, i32, i32) {
    %c0_i32 = arith.constant 0 : i32
    %c0_i32_0 = arith.constant 0 : i32
    %c0_i32_1 = arith.constant 0 : i32
    return %arg0, %c0_i32, %c0_i32_0 : i32, i32, i32
  }
}

module attributes {stable_mosaic.version = 11 : i64} {
  func.func @_ffn_kernel(%arg0: i32, %arg1: memref<16x32xf32, #tpu.memory_space<vmem>>, %arg2: memref<1x32xf32, #tpu.memory_space<vmem>>, %arg3: memref<1x32xf32, #tpu.memory_space<vmem>>, %arg4: memref<32x64xbf16, #tpu.memory_space<vmem>>, %arg5: memref<1x64xf32, #tpu.memory_space<vmem>>, %arg6: memref<64x32xbf16, #tpu.memory_space<vmem>>, %arg7: memref<1x32xf32, #tpu.memory_space<vmem>>, %arg8: memref<1x32xf32, #tpu.memory_space<vmem>>, %arg9: memref<1x32xf32, #tpu.memory_space<vmem>>, %arg10: memref<16x32xf32, #tpu.memory_space<vmem>>) attributes {dimension_semantics = [#tpu.dimension_semantics<parallel>], iteration_bounds = array<i64: 1>, scalar_prefetch = 0 : i64, scratch_operands = 0 : i64, tpu.core_type = #tpu.core_type<tc>, window_params = [{transform_indices = @transform_0, window_bounds = array<i64: 16, 32>}, {pipeline_mode = #tpu.pipeline_mode<synchronous>, transform_indices = @transform_1, window_bounds = array<i64: 1, 32>}, {pipeline_mode = #tpu.pipeline_mode<synchronous>, transform_indices = @transform_2, window_bounds = array<i64: 1, 32>}, {pipeline_mode = #tpu.pipeline_mode<synchronous>, transform_indices = @transform_3, window_bounds = array<i64: 32, 64>}, {pipeline_mode = #tpu.pipeline_mode<synchronous>, transform_indices = @transform_4, window_bounds = array<i64: 1, 64>}, {pipeline_mode = #tpu.pipeline_mode<synchronous>, transform_indices = @transform_5, window_bounds = array<i64: 64, 32>}, {pipeline_mode = #tpu.pipeline_mode<synchronous>, transform_indices = @transform_6, window_bounds = array<i64: 1, 32>}, {pipeline_mode = #tpu.pipeline_mode<synchronous>, transform_indices = @transform_7, window_bounds = array<i64: 1, 32>}, {pipeline_mode = #tpu.pipeline_mode<synchronous>, transform_indices = @transform_8, window_bounds = array<i64: 1, 32>}, {transform_indices = @transform_9, window_bounds = array<i64: 16, 32>}]} {
    %c0 = arith.constant 0 : index
    %c0_0 = arith.constant 0 : index
    %0 = vector.load %arg1[%c0, %c0_0] : memref<16x32xf32, #tpu.memory_space<vmem>>, vector<16x32xf32>
    %c0_1 = arith.constant 0 : index
    %c0_2 = arith.constant 0 : index
    %1 = vector.load %arg2[%c0_1, %c0_2] : memref<1x32xf32, #tpu.memory_space<vmem>>, vector<1x32xf32>
    %c0_3 = arith.constant 0 : index
    %c0_4 = arith.constant 0 : index
    %2 = vector.load %arg3[%c0_3, %c0_4] : memref<1x32xf32, #tpu.memory_space<vmem>>, vector<1x32xf32>
    %cst = arith.constant dense<0.000000e+00> : vector<16xf32>
    %3 = vector.multi_reduction <add>, %0, %cst [1] : vector<16x32xf32> to vector<16xf32>
    %4 = vector.shape_cast %3 : vector<16xf32> to vector<16x1xf32>
    %cst_5 = arith.constant 3.200000e+01 : f32
    %5 = vector.broadcast %cst_5 : f32 to vector<16x1xf32>
    %6 = arith.divf %4, %5 : vector<16x1xf32>
    %7 = vector.broadcast %6 : vector<16x1xf32> to vector<16x32xf32>
    %8 = arith.subf %0, %7 : vector<16x32xf32>
    %9 = arith.mulf %8, %8 : vector<16x32xf32>
    %cst_6 = arith.constant dense<0.000000e+00> : vector<16xf32>
    %10 = vector.multi_reduction <add>, %9, %cst_6 [1] : vector<16x32xf32> to vector<16xf32>
    %11 = vector.shape_cast %10 : vector<16xf32> to vector<16x1xf32>
    %cst_7 = arith.constant 3.200000e+01 : f32
    %12 = vector.broadcast %cst_7 : f32 to vector<16x1xf32>
    %13 = arith.divf %11, %12 : vector<16x1xf32>
    %14 = vector.broadcast %6 : vector<16x1xf32> to vector<16x32xf32>
    %15 = arith.subf %0, %14 : vector<16x32xf32>
    %cst_8 = arith.constant 9.99999974E-6 : f32
    %16 = vector.broadcast %cst_8 : f32 to vector<16x1xf32>
    %17 = arith.addf %13, %16 : vector<16x1xf32>
    %18 = math.rsqrt %17 : vector<16x1xf32>
    %19 = vector.broadcast %18 : vector<16x1xf32> to vector<16x32xf32>
    %20 = arith.mulf %15, %19 : vector<16x32xf32>
    %21 = vector.broadcast %1 : vector<1x32xf32> to vector<16x32xf32>
    %22 = arith.mulf %20, %21 : vector<16x32xf32>
    %23 = vector.broadcast %2 : vector<1x32xf32> to vector<16x32xf32>
    %24 = arith.addf %22, %23 : vector<16x32xf32>
    %25 = arith.truncf %24 : vector<16x32xf32> to vector<16x32xbf16>
    %c0_9 = arith.constant 0 : index
    %c0_10 = arith.constant 0 : index
    %26 = vector.load %arg4[%c0_9, %c0_10] : memref<32x64xbf16, #tpu.memory_space<vmem>>, vector<32x64xbf16>
    %cst_11 = arith.constant dense<0.000000e+00> : vector<16x64xf32>
    %27 = tpu.matmul %25, %26, %cst_11 {dimension_numbers = #tpu.dot_dimension_numbers<[1], [0], [0], [1], [0, 0, 1, 1], [], []>} : vector<16x32xbf16>, vector<32x64xbf16>, vector<16x64xf32> -> vector<16x64xf32>
    %c0_12 = arith.constant 0 : index
    %c0_13 = arith.constant 0 : index
    %28 = vector.load %arg5[%c0_12, %c0_13] : memref<1x64xf32, #tpu.memory_space<vmem>>, vector<1x64xf32>
    %29 = vector.broadcast %28 : vector<1x64xf32> to vector<16x64xf32>
    %30 = arith.addf %27, %29 : vector<16x64xf32>
    %31 = arith.negf %30 : vector<16x64xf32>
    %32 = math.exp %31 : vector<16x64xf32>
    %cst_14 = arith.constant 1.000000e+00 : f32
    %33 = vector.broadcast %cst_14 : f32 to vector<16x64xf32>
    %34 = arith.addf %33, %32 : vector<16x64xf32>
    %35 = arith.divf %33, %34 : vector<16x64xf32>
    %36 = arith.mulf %30, %35 : vector<16x64xf32>
    %37 = arith.truncf %36 : vector<16x64xf32> to vector<16x64xbf16>
    %c0_15 = arith.constant 0 : index
    %c0_16 = arith.constant 0 : index
    %38 = vector.load %arg6[%c0_15, %c0_16] : memref<64x32xbf16, #tpu.memory_space<vmem>>, vector<64x32xbf16>
    %cst_17 = arith.constant dense<0.000000e+00> : vector<16x32xf32>
    %39 = tpu.matmul %37, %38, %cst_17 {dimension_numbers = #tpu.dot_dimension_numbers<[1], [0], [0], [1], [0, 0, 1, 1], [], []>} : vector<16x64xbf16>, vector<64x32xbf16>, vector<16x32xf32> -> vector<16x32xf32>
    %c0_18 = arith.constant 0 : index
    %c0_19 = arith.constant 0 : index
    %40 = vector.load %arg7[%c0_18, %c0_19] : memref<1x32xf32, #tpu.memory_space<vmem>>, vector<1x32xf32>
    %41 = vector.broadcast %40 : vector<1x32xf32> to vector<16x32xf32>
    %42 = arith.addf %39, %41 : vector<16x32xf32>
    %cst_20 = arith.constant 1.000000e+00 : f32
    %43 = vector.broadcast %cst_20 : f32 to vector<16x32xf32>
    %44 = arith.mulf %43, %42 : vector<16x32xf32>
    %45 = arith.addf %0, %44 : vector<16x32xf32>
    %c0_21 = arith.constant 0 : index
    %c0_22 = arith.constant 0 : index
    %46 = vector.load %arg8[%c0_21, %c0_22] : memref<1x32xf32, #tpu.memory_space<vmem>>, vector<1x32xf32>
    %c0_23 = arith.constant 0 : index
    %c0_24 = arith.constant 0 : index
    %47 = vector.load %arg9[%c0_23, %c0_24] : memref<1x32xf32, #tpu.memory_space<vmem>>, vector<1x32xf32>
    %cst_25 = arith.constant dense<0.000000e+00> : vector<16xf32>
    %48 = vector.multi_reduction <add>, %45, %cst_25 [1] : vector<16x32xf32> to vector<16xf32>
    %49 = vector.shape_cast %48 : vector<16xf32> to vector<16x1xf32>
    %cst_26 = arith.constant 3.200000e+01 : f32
    %50 = vector.broadcast %cst_26 : f32 to vector<16x1xf32>
    %51 = arith.divf %49, %50 : vector<16x1xf32>
    %52 = vector.broadcast %51 : vector<16x1xf32> to vector<16x32xf32>
    %53 = arith.subf %45, %52 : vector<16x32xf32>
    %54 = arith.mulf %53, %53 : vector<16x32xf32>
    %cst_27 = arith.constant dense<0.000000e+00> : vector<16xf32>
    %55 = vector.multi_reduction <add>, %54, %cst_27 [1] : vector<16x32xf32> to vector<16xf32>
    %56 = vector.shape_cast %55 : vector<16xf32> to vector<16x1xf32>
    %cst_28 = arith.constant 3.200000e+01 : f32
    %57 = vector.broadcast %cst_28 : f32 to vector<16x1xf32>
    %58 = arith.divf %56, %57 : vector<16x1xf32>
    %59 = vector.broadcast %51 : vector<16x1xf32> to vector<16x32xf32>
    %60 = arith.subf %45, %59 : vector<16x32xf32>
    %cst_29 = arith.constant 9.99999974E-6 : f32
    %61 = vector.broadcast %cst_29 : f32 to vector<16x1xf32>
    %62 = arith.addf %58, %61 : vector<16x1xf32>
    %63 = math.rsqrt %62 : vector<16x1xf32>
    %64 = vector.broadcast %63 : vector<16x1xf32> to vector<16x32xf32>
    %65 = arith.mulf %60, %64 : vector<16x32xf32>
    %66 = vector.broadcast %46 : vector<1x32xf32> to vector<16x32xf32>
    %67 = arith.mulf %65, %66 : vector<16x32xf32>
    %68 = vector.broadcast %47 : vector<1x32xf32> to vector<16x32xf32>
    %69 = arith.addf %67, %68 : vector<16x32xf32>
    %c0_30 = arith.constant 0 : index
    %c0_31 = arith.constant 0 : index
    %70 = vector.load %arg10[%c0_30, %c0_31] : memref<16x32xf32, #tpu.memory_space<vmem>>, vector<16x32xf32>
    tpu.vector_store %arg10[%c0_30, %c0_31], %69 {strides = array<i32>} : memref<16x32xf32, #tpu.memory_space<vmem>>, vector<16x32xf32>,
    return
  }
  func.func @transform_0(%arg0: i32) -> (i32, i32) {
    %c0_i32 = arith.constant 0 : i32
    %c0_i32_0 = arith.constant 0 : i32
    return %arg0, %c0_i32 : i32, i32
  }
  func.func @transform_1(%arg0: i32) -> (i32, i32) {
    %c0_i32 = arith.constant 0 : i32
    %c0_i32_0 = arith.constant 0 : i32
    %c0_i32_1 = arith.constant 0 : i32
    return %c0_i32, %c0_i32_0 : i32, i32
  }
  func.func @transform_2(%arg0: i32) -> (i32, i32) {
    %c0_i32 = arith.constant 0 : i32
    %c0_i32_0 = arith.constant 0 : i32
    %c0_i32_1 = arith.constant 0 : i32
    return %c0_i32, %c0_i32_0 : i32, i32
  }
  func.func @transform_3(%arg0: i32) -> (i32, i32) {
    %c0_i32 = arith.constant 0 : i32
    %c0_i32_0 = arith.constant 0 : i32
    %c0_i32_1 = arith.constant 0 : i32
    return %c0_i32, %c0_i32_0 : i32, i32
  }
  func.func @transform_4(%arg0: i32) -> (i32, i32) {
    %c0_i32 = arith.constant 0 : i32
    %c0_i32_0 = arith.constant 0 : i32
    %c0_i32_1 = arith.constant 0 : i32
    return %c0_i32, %c0_i32_0 : i32, i32
  }
  func.func @transform_5(%arg0: i32) -> (i32, i32) {
    %c0_i32 = arith.constant 0 : i32
    %c0_i32_0 = arith.constant 0 : i32
    %c0_i32_1 = arith.constant 0 : i32
    return %c0_i32, %c0_i32_0 : i32, i32
  }
  func.func @transform_6(%arg0: i32) -> (i32, i32) {
    %c0_i32 = arith.constant 0 : i32
    %c0_i32_0 = arith.constant 0 : i32
    %c0_i32_1 = arith.constant 0 : i32
    return %c0_i32, %c0_i32_0 : i32, i32
  }
  func.func @transform_7(%arg0: i32) -> (i32, i32) {
    %c0_i32 = arith.constant 0 : i32
    %c0_i32_0 = arith.constant 0 : i32
    %c0_i32_1 = arith.constant 0 : i32
    return %c0_i32, %c0_i32_0 : i32, i32
  }
  func.func @transform_8(%arg0: i32) -> (i32, i32) {
    %c0_i32 = arith.constant 0 : i32
    %c0_i32_0 = arith.constant 0 : i32
    %c0_i32_1 = arith.constant 0 : i32
    return %c0_i32, %c0_i32_0 : i32, i32
  }
  func.func @transform_9(%arg0: i32) -> (i32, i32) {
    %c0_i32 = arith.constant 0 : i32
    %c0_i32_0 = arith.constant 0 : i32
    return %arg0, %c0_i32 : i32, i32
  }
}

module attributes {stable_mosaic.version = 11 : i64} {
  func.func @_layernorm_kernel(%arg0: i32, %arg1: memref<16x32xf32, #tpu.memory_space<vmem>>, %arg2: memref<1x32xf32, #tpu.memory_space<vmem>>, %arg3: memref<1x32xf32, #tpu.memory_space<vmem>>, %arg4: memref<16x32xf32, #tpu.memory_space<vmem>>) attributes {dimension_semantics = [#tpu.dimension_semantics<parallel>], iteration_bounds = array<i64: 1>, scalar_prefetch = 0 : i64, scratch_operands = 0 : i64, tpu.core_type = #tpu.core_type<tc>, window_params = [{transform_indices = @transform_0, window_bounds = array<i64: 16, 32>}, {pipeline_mode = #tpu.pipeline_mode<synchronous>, transform_indices = @transform_1, window_bounds = array<i64: 1, 32>}, {pipeline_mode = #tpu.pipeline_mode<synchronous>, transform_indices = @transform_2, window_bounds = array<i64: 1, 32>}, {transform_indices = @transform_3, window_bounds = array<i64: 16, 32>}]} {
    %c0 = arith.constant 0 : index
    %c0_0 = arith.constant 0 : index
    %0 = vector.load %arg1[%c0, %c0_0] : memref<16x32xf32, #tpu.memory_space<vmem>>, vector<16x32xf32>
    %c0_1 = arith.constant 0 : index
    %c0_2 = arith.constant 0 : index
    %1 = vector.load %arg2[%c0_1, %c0_2] : memref<1x32xf32, #tpu.memory_space<vmem>>, vector<1x32xf32>
    %c0_3 = arith.constant 0 : index
    %c0_4 = arith.constant 0 : index
    %2 = vector.load %arg3[%c0_3, %c0_4] : memref<1x32xf32, #tpu.memory_space<vmem>>, vector<1x32xf32>
    %cst = arith.constant dense<0.000000e+00> : vector<16xf32>
    %3 = vector.multi_reduction <add>, %0, %cst [1] : vector<16x32xf32> to vector<16xf32>
    %4 = vector.shape_cast %3 : vector<16xf32> to vector<16x1xf32>
    %cst_5 = arith.constant 3.200000e+01 : f32
    %5 = vector.broadcast %cst_5 : f32 to vector<16x1xf32>
    %6 = arith.divf %4, %5 : vector<16x1xf32>
    %7 = vector.broadcast %6 : vector<16x1xf32> to vector<16x32xf32>
    %8 = arith.subf %0, %7 : vector<16x32xf32>
    %9 = arith.mulf %8, %8 : vector<16x32xf32>
    %cst_6 = arith.constant dense<0.000000e+00> : vector<16xf32>
    %10 = vector.multi_reduction <add>, %9, %cst_6 [1] : vector<16x32xf32> to vector<16xf32>
    %11 = vector.shape_cast %10 : vector<16xf32> to vector<16x1xf32>
    %cst_7 = arith.constant 3.200000e+01 : f32
    %12 = vector.broadcast %cst_7 : f32 to vector<16x1xf32>
    %13 = arith.divf %11, %12 : vector<16x1xf32>
    %14 = vector.broadcast %6 : vector<16x1xf32> to vector<16x32xf32>
    %15 = arith.subf %0, %14 : vector<16x32xf32>
    %cst_8 = arith.constant 9.99999974E-6 : f32
    %16 = vector.broadcast %cst_8 : f32 to vector<16x1xf32>
    %17 = arith.addf %13, %16 : vector<16x1xf32>
    %18 = math.rsqrt %17 : vector<16x1xf32>
    %19 = vector.broadcast %18 : vector<16x1xf32> to vector<16x32xf32>
    %20 = arith.mulf %15, %19 : vector<16x32xf32>
    %21 = vector.broadcast %1 : vector<1x32xf32> to vector<16x32xf32>
    %22 = arith.mulf %20, %21 : vector<16x32xf32>
    %23 = vector.broadcast %2 : vector<1x32xf32> to vector<16x32xf32>
    %24 = arith.addf %22, %23 : vector<16x32xf32>
    %c0_9 = arith.constant 0 : index
    %c0_10 = arith.constant 0 : index
    %25 = vector.load %arg4[%c0_9, %c0_10] : memref<16x32xf32, #tpu.memory_space<vmem>>, vector<16x32xf32>
    tpu.vector_store %arg4[%c0_9, %c0_10], %24 {strides = array<i32>} : memref<16x32xf32, #tpu.memory_space<vmem>>, vector<16x32xf32>,
    return
  }
  func.func @transform_0(%arg0: i32) -> (i32, i32) {
    %c0_i32 = arith.constant 0 : i32
    %c0_i32_0 = arith.constant 0 : i32
    return %arg0, %c0_i32 : i32, i32
  }
  func.func @transform_1(%arg0: i32) -> (i32, i32) {
    %c0_i32 = arith.constant 0 : i32
    %c0_i32_0 = arith.constant 0 : i32
    %c0_i32_1 = arith.constant 0 : i32
    return %c0_i32, %c0_i32_0 : i32, i32
  }
  func.func @transform_2(%arg0: i32) -> (i32, i32) {
    %c0_i32 = arith.constant 0 : i32
    %c0_i32_0 = arith.constant 0 : i32
    %c0_i32_1 = arith.constant 0 : i32
    return %c0_i32, %c0_i32_0 : i32, i32
  }
  func.func @transform_3(%arg0: i32) -> (i32, i32) {
    %c0_i32 = arith.constant 0 : i32
    %c0_i32_0 = arith.constant 0 : i32
    return %arg0, %c0_i32 : i32, i32
  }
}

module attributes {stable_mosaic.version = 11 : i64} {
  func.func @_attn_kernel(%arg0: i32, %arg1: i32, %arg2: memref<1x8x32xbf16, #tpu.memory_space<vmem>>, %arg3: memref<1x8x64xbf16, #tpu.memory_space<vmem>>, %arg4: memref<1x2x8x8xbf16, #tpu.memory_space<vmem>>, %arg5: memref<1x1x8xf32, #tpu.memory_space<vmem>>, %arg6: memref<1x32xf32, #tpu.memory_space<vmem>>, %arg7: memref<32x32xbf16, #tpu.memory_space<vmem>>, %arg8: memref<1x32xf32, #tpu.memory_space<vmem>>, %arg9: memref<1x8x32xf32, #tpu.memory_space<vmem>>, %arg10: memref<1x8x32xf32, #tpu.memory_space<vmem>>) attributes {dimension_semantics = [#tpu.dimension_semantics<parallel>, #tpu.dimension_semantics<parallel>], iteration_bounds = array<i64: 2, 1>, scalar_prefetch = 0 : i64, scratch_operands = 0 : i64, tpu.core_type = #tpu.core_type<tc>, window_params = [{transform_indices = @transform_0, window_bounds = array<i64: 1, 8, 32>}, {transform_indices = @transform_1, window_bounds = array<i64: 1, 8, 64>}, {transform_indices = @transform_2, window_bounds = array<i64: 1, 2, 8, 8>}, {transform_indices = @transform_3, window_bounds = array<i64: 1, 1, 8>}, {pipeline_mode = #tpu.pipeline_mode<synchronous>, transform_indices = @transform_4, window_bounds = array<i64: 1, 32>}, {pipeline_mode = #tpu.pipeline_mode<synchronous>, transform_indices = @transform_5, window_bounds = array<i64: 32, 32>}, {pipeline_mode = #tpu.pipeline_mode<synchronous>, transform_indices = @transform_6, window_bounds = array<i64: 1, 32>}, {transform_indices = @transform_7, window_bounds = array<i64: 1, 8, 32>}, {transform_indices = @transform_8, window_bounds = array<i64: 1, 8, 32>}]} {
    %c0 = arith.constant 0 : index
    %c0_0 = arith.constant 0 : index
    %c0_1 = arith.constant 0 : index
    %0 = vector.load %arg2[%c0, %c0_0, %c0_1] : memref<1x8x32xbf16, #tpu.memory_space<vmem>>, vector<1x8x32xbf16>
    %1 = vector.shape_cast %0 : vector<1x8x32xbf16> to vector<8x32xbf16>
    %2 = arith.extf %1 : vector<8x32xbf16> to vector<8x32xf32>
    %c0_2 = arith.constant 0 : index
    %c0_3 = arith.constant 0 : index
    %3 = vector.load %arg6[%c0_2, %c0_3] : memref<1x32xf32, #tpu.memory_space<vmem>>, vector<1x32xf32>
    %4 = vector.broadcast %3 : vector<1x32xf32> to vector<8x32xf32>
    %5 = arith.addf %2, %4 : vector<8x32xf32>
    %c0_4 = arith.constant 0 : index
    %c0_5 = arith.constant 0 : index
    %c0_6 = arith.constant 0 : index
    %6 = vector.load %arg3[%c0_4, %c0_5, %c0_6] : memref<1x8x64xbf16, #tpu.memory_space<vmem>>, vector<1x8x64xbf16>
    %7 = vector.shape_cast %6 : vector<1x8x64xbf16> to vector<8x64xbf16>
    %c0_7 = arith.constant 0 : index
    %c0_8 = arith.constant 0 : index
    %c0_9 = arith.constant 0 : index
    %8 = vector.load %arg5[%c0_7, %c0_8, %c0_9] : memref<1x1x8xf32, #tpu.memory_space<vmem>>, vector<1x1x8xf32>
    %9 = vector.shape_cast %8 : vector<1x1x8xf32> to vector<1x8xf32>
    %10 = vector.extract_strided_slice %5 {offsets = [0, 0], sizes = [8, 16], strides = [1, 1]} : vector<8x32xf32> to vector<8x16xf32>
    %11 = arith.truncf %10 : vector<8x16xf32> to vector<8x16xbf16>
    %12 = vector.extract_strided_slice %7 {offsets = [0, 0], sizes = [8, 16], strides = [1, 1]} : vector<8x64xbf16> to vector<8x16xbf16>
    %13 = vector.extract_strided_slice %7 {offsets = [0, 32], sizes = [8, 16], strides = [1, 1]} : vector<8x64xbf16> to vector<8x16xbf16>
    %cst = arith.constant dense<0.000000e+00> : vector<8x8xf32>
    %14 = tpu.matmul %11, %12, %cst {dimension_numbers = #tpu.dot_dimension_numbers<[1], [1], [0], [0], [0, 0, 1, 0], [], []>} : vector<8x16xbf16>, vector<8x16xbf16>, vector<8x8xf32> -> vector<8x8xf32>
    %c0_10 = arith.constant 0 : index
    %c0_11 = arith.constant 0 : index
    %c0_12 = arith.constant 0 : index
    %c0_13 = arith.constant 0 : index
    %15 = vector.load %arg4[%c0_10, %c0_11, %c0_12, %c0_13] : memref<1x2x8x8xbf16, #tpu.memory_space<vmem>>, vector<1x1x8x8xbf16>
    %16 = vector.shape_cast %15 : vector<1x1x8x8xbf16> to vector<8x8xbf16>
    %17 = arith.extf %16 : vector<8x8xbf16> to vector<8x8xf32>
    %18 = arith.addf %14, %17 : vector<8x8xf32>
    %19 = vector.broadcast %9 : vector<1x8xf32> to vector<8x8xf32>
    %20 = arith.addf %18, %19 : vector<8x8xf32>
    %cst_14 = arith.constant dense<0xFF800000> : vector<8xf32>
    %21 = vector.multi_reduction <maximumf>, %20, %cst_14 [1] : vector<8x8xf32> to vector<8xf32>
    %22 = vector.shape_cast %21 : vector<8xf32> to vector<8x1xf32>
    %23 = vector.broadcast %22 : vector<8x1xf32> to vector<8x8xf32>
    %24 = arith.subf %20, %23 : vector<8x8xf32>
    %25 = math.exp %24 : vector<8x8xf32>
    %cst_15 = arith.constant dense<0.000000e+00> : vector<8xf32>
    %26 = vector.multi_reduction <add>, %25, %cst_15 [1] : vector<8x8xf32> to vector<8xf32>
    %27 = vector.shape_cast %26 : vector<8xf32> to vector<8x1xf32>
    %28 = tpu.reciprocal %27 {approx = true} : vector<8x1xf32> -> vector<8x1xf32>
    %29 = vector.broadcast %28 : vector<8x1xf32> to vector<8x8xf32>
    %30 = arith.mulf %25, %29 : vector<8x8xf32>
    %31 = arith.truncf %30 : vector<8x8xf32> to vector<8x8xbf16>
    %cst_16 = arith.constant dense<0.000000e+00> : vector<8x16xf32>
    %32 = tpu.matmul %31, %13, %cst_16 {dimension_numbers = #tpu.dot_dimension_numbers<[1], [0], [0], [1], [0, 0, 1, 1], [], []>} : vector<8x8xbf16>, vector<8x16xbf16>, vector<8x16xf32> -> vector<8x16xf32>
    %33 = vector.extract_strided_slice %5 {offsets = [0, 16], sizes = [8, 16], strides = [1, 1]} : vector<8x32xf32> to vector<8x16xf32>
    %34 = arith.truncf %33 : vector<8x16xf32> to vector<8x16xbf16>
    %35 = vector.extract_strided_slice %7 {offsets = [0, 16], sizes = [8, 16], strides = [1, 1]} : vector<8x64xbf16> to vector<8x16xbf16>
    %36 = vector.extract_strided_slice %7 {offsets = [0, 48], sizes = [8, 16], strides = [1, 1]} : vector<8x64xbf16> to vector<8x16xbf16>
    %cst_17 = arith.constant dense<0.000000e+00> : vector<8x8xf32>
    %37 = tpu.matmul %34, %35, %cst_17 {dimension_numbers = #tpu.dot_dimension_numbers<[1], [1], [0], [0], [0, 0, 1, 0], [], []>} : vector<8x16xbf16>, vector<8x16xbf16>, vector<8x8xf32> -> vector<8x8xf32>
    %c0_18 = arith.constant 0 : index
    %c1 = arith.constant 1 : index
    %c0_19 = arith.constant 0 : index
    %c0_20 = arith.constant 0 : index
    %38 = vector.load %arg4[%c0_18, %c1, %c0_19, %c0_20] : memref<1x2x8x8xbf16, #tpu.memory_space<vmem>>, vector<1x1x8x8xbf16>
    %39 = vector.shape_cast %38 : vector<1x1x8x8xbf16> to vector<8x8xbf16>
    %40 = arith.extf %39 : vector<8x8xbf16> to vector<8x8xf32>
    %41 = arith.addf %37, %40 : vector<8x8xf32>
    %42 = vector.broadcast %9 : vector<1x8xf32> to vector<8x8xf32>
    %43 = arith.addf %41, %42 : vector<8x8xf32>
    %cst_21 = arith.constant dense<0xFF800000> : vector<8xf32>
    %44 = vector.multi_reduction <maximumf>, %43, %cst_21 [1] : vector<8x8xf32> to vector<8xf32>
    %45 = vector.shape_cast %44 : vector<8xf32> to vector<8x1xf32>
    %46 = vector.broadcast %45 : vector<8x1xf32> to vector<8x8xf32>
    %47 = arith.subf %43, %46 : vector<8x8xf32>
    %48 = math.exp %47 : vector<8x8xf32>
    %cst_22 = arith.constant dense<0.000000e+00> : vector<8xf32>
    %49 = vector.multi_reduction <add>, %48, %cst_22 [1] : vector<8x8xf32> to vector<8xf32>
    %50 = vector.shape_cast %49 : vector<8xf32> to vector<8x1xf32>
    %51 = tpu.reciprocal %50 {approx = true} : vector<8x1xf32> -> vector<8x1xf32>
    %52 = vector.broadcast %51 : vector<8x1xf32> to vector<8x8xf32>
    %53 = arith.mulf %48, %52 : vector<8x8xf32>
    %54 = arith.truncf %53 : vector<8x8xf32> to vector<8x8xbf16>
    %cst_23 = arith.constant dense<0.000000e+00> : vector<8x16xf32>
    %55 = tpu.matmul %54, %36, %cst_23 {dimension_numbers = #tpu.dot_dimension_numbers<[1], [0], [0], [1], [0, 0, 1, 1], [], []>} : vector<8x8xbf16>, vector<8x16xbf16>, vector<8x16xf32> -> vector<8x16xf32>
    %56 = tpu.concatenate %32, %55 in 1 : vector<8x16xf32>, vector<8x16xf32> -> vector<8x32xf32>
    %57 = arith.truncf %56 : vector<8x32xf32> to vector<8x32xbf16>
    %c0_24 = arith.constant 0 : index
    %c0_25 = arith.constant 0 : index
    %58 = vector.load %arg7[%c0_24, %c0_25] : memref<32x32xbf16, #tpu.memory_space<vmem>>, vector<32x32xbf16>
    %cst_26 = arith.constant dense<0.000000e+00> : vector<8x32xf32>
    %59 = tpu.matmul %57, %58, %cst_26 {dimension_numbers = #tpu.dot_dimension_numbers<[1], [0], [0], [1], [0, 0, 1, 1], [], []>} : vector<8x32xbf16>, vector<32x32xbf16>, vector<8x32xf32> -> vector<8x32xf32>
    %c0_27 = arith.constant 0 : index
    %c0_28 = arith.constant 0 : index
    %60 = vector.load %arg8[%c0_27, %c0_28] : memref<1x32xf32, #tpu.memory_space<vmem>>, vector<1x32xf32>
    %61 = vector.broadcast %60 : vector<1x32xf32> to vector<8x32xf32>
    %62 = arith.addf %59, %61 : vector<8x32xf32>
    %c0_29 = arith.constant 0 : index
    %c0_30 = arith.constant 0 : index
    %c0_31 = arith.constant 0 : index
    %63 = vector.load %arg9[%c0_29, %c0_30, %c0_31] : memref<1x8x32xf32, #tpu.memory_space<vmem>>, vector<1x8x32xf32>
    %64 = vector.shape_cast %63 : vector<1x8x32xf32> to vector<8x32xf32>
    %65 = arith.addf %64, %62 : vector<8x32xf32>
    %c0_32 = arith.constant 0 : index
    %c0_33 = arith.constant 0 : index
    %c0_34 = arith.constant 0 : index
    %66 = vector.load %arg10[%c0_32, %c0_33, %c0_34] : memref<1x8x32xf32, #tpu.memory_space<vmem>>, vector<1x8x32xf32>
    %67 = vector.shape_cast %66 : vector<1x8x32xf32> to vector<8x32xf32>
    %68 = vector.shape_cast %65 : vector<8x32xf32> to vector<1x8x32xf32>
    tpu.vector_store %arg10[%c0_32, %c0_33, %c0_34], %68 {strides = array<i32>} : memref<1x8x32xf32, #tpu.memory_space<vmem>>, vector<1x8x32xf32>,
    return
  }
  func.func @transform_0(%arg0: i32, %arg1: i32) -> (i32, i32, i32) {
    %c0_i32 = arith.constant 0 : i32
    %c0_i32_0 = arith.constant 0 : i32
    return %arg0, %arg1, %c0_i32 : i32, i32, i32
  }
  func.func @transform_1(%arg0: i32, %arg1: i32) -> (i32, i32, i32) {
    %c0_i32 = arith.constant 0 : i32
    %c0_i32_0 = arith.constant 0 : i32
    %c0_i32_1 = arith.constant 0 : i32
    return %arg0, %c0_i32, %c0_i32_0 : i32, i32, i32
  }
  func.func @transform_2(%arg0: i32, %arg1: i32) -> (i32, i32, i32, i32) {
    %c0_i32 = arith.constant 0 : i32
    %c0_i32_0 = arith.constant 0 : i32
    %c0_i32_1 = arith.constant 0 : i32
    return %arg0, %c0_i32, %arg1, %c0_i32_0 : i32, i32, i32, i32
  }
  func.func @transform_3(%arg0: i32, %arg1: i32) -> (i32, i32, i32) {
    %c0_i32 = arith.constant 0 : i32
    %c0_i32_0 = arith.constant 0 : i32
    %c0_i32_1 = arith.constant 0 : i32
    return %arg0, %c0_i32, %c0_i32_0 : i32, i32, i32
  }
  func.func @transform_4(%arg0: i32, %arg1: i32) -> (i32, i32) {
    %c0_i32 = arith.constant 0 : i32
    %c0_i32_0 = arith.constant 0 : i32
    %c0_i32_1 = arith.constant 0 : i32
    return %c0_i32, %c0_i32_0 : i32, i32
  }
  func.func @transform_5(%arg0: i32, %arg1: i32) -> (i32, i32) {
    %c0_i32 = arith.constant 0 : i32
    %c0_i32_0 = arith.constant 0 : i32
    %c0_i32_1 = arith.constant 0 : i32
    return %c0_i32, %c0_i32_0 : i32, i32
  }
  func.func @transform_6(%arg0: i32, %arg1: i32) -> (i32, i32) {
    %c0_i32 = arith.constant 0 : i32
    %c0_i32_0 = arith.constant 0 : i32
    %c0_i32_1 = arith.constant 0 : i32
    return %c0_i32, %c0_i32_0 : i32, i32
  }
  func.func @transform_7(%arg0: i32, %arg1: i32) -> (i32, i32, i32) {
    %c0_i32 = arith.constant 0 : i32
    %c0_i32_0 = arith.constant 0 : i32
    return %arg0, %arg1, %c0_i32 : i32, i32, i32
  }
  func.func @transform_8(%arg0: i32, %arg1: i32) -> (i32, i32, i32) {
    %c0_i32 = arith.constant 0 : i32
    %c0_i32_0 = arith.constant 0 : i32
    return %arg0, %arg1, %c0_i32 : i32, i32, i32
  }
}

</mosaic_0001>

<bundles_post_ra>
// kernel: run.13
= control target key start
LH: loop header
LB: loop body
LE: loop exit
PB: predicated region body
PF: predicated region fallthrough
CT: control target
= control target key end

     0   :  { %vm37_vm0 = vcmask 261120   ;;  %v320_v15 = vmov 0.0   ;;  %vm321_vm1 = vmmov 0   ;;  %vm203_vm2 = vcmask 523264   ;;  %s431_s0 = inlined_call_operand.vmem [shape: f32[16,32], index: 0, kind: input, shape index: {}]   ;;  %s432_s7 = inlined_call_operand.vmem [shape: f32[1,32], index: 7, kind: input, shape index: {}, may-alias: {1,7}]   ;;  %s433_s8 = inlined_call_operand.vmem [shape: f32[1,32], index: 8, kind: input, shape index: {}, may-alias: {2,8}]   ;;  %s434_s3 = inlined_call_operand.vmem [shape: bf16[32,64], index: 3, kind: input, shape index: {}]   ;;  %s435_s1 = inlined_call_operand.vmem [shape: f32[1,32], index: 1, kind: input, shape index: {}, may-alias: {1,7}]   ;;  %s436_s2 = inlined_call_operand.vmem [shape: f32[1,32], index: 2, kind: input, shape index: {}, may-alias: {2,8}]   ;;  %s437_s5 = inlined_call_operand.vmem [shape: bf16[64,32], index: 5, kind: input, shape index: {}]   ;;  %s438_s4 = inlined_call_operand.vmem [shape: f32[1,64], index: 4, kind: input, shape index: {}]   ;;  %s439_s6 = inlined_call_operand.vmem [shape: f32[1,32], index: 6, kind: input, shape index: {}]   ;;  %s440_s9 = inlined_call_operand.vmem [shape: f32[16,32], index: 9, kind: output, shape index: {}]  }
   0x1   :  { %v375_v0 = vld [vmem:[%s431_s0] sm:$0xff]  ;;  %v380_v1 = vld [vmem:[%s431_s0 + $0x8] sm:$0xff]  ;;  %280 = vmatprep.subr.bf16.mxu0 %v320_v15  ;;  %288 = vmatprep.subr.bf16.mxu1 %v320_v15  ;;  %v306_v36 = vld [vmem:[%s437_s5 + $0x10] sm:$0xff]  }
   0x2   :  { %v38_v2 = vsel %vm37_vm0, %v375_v0, 0.0  ;;  %v41_v3 = vsel %vm37_vm0, %v380_v1, 0.0  ;;  %v302_v14 = vld [vmem:[%s434_s3] sm:$0xff]   ;;  %v303_v16 = vld [vmem:[%s434_s3 + $0x8] sm:$0xff]   ;;  %284 = vmatprep.mubr.msk.bf16.mxu0 %vm321_vm1, %v320_v15  ;;  %296 = vmatprep.mubr.msk.bf16.mxu1 %vm321_vm1, %v320_v15  ;;  %v307_v37 = vld [vmem:[%s437_s5 + $0x18] sm:$0xff]  }
   0x3   :  { %39 = vadd.xlane.f32.xlu0 %v38_v2  ;;  %281 = vmatpush3.bf16.msra.mxu0 %v302_v14  ;;  %v258_v25 = vld [vmem:[%s435_s1] ss:$0 sm:$0xff]  ;;  %v305_v35 = vld [vmem:[%s437_s5 + $0x8] sm:$0xff]  }
   0x4   :  { %282 = vmatprep.subr.bf16.mxu0 %v320_v15  ;;  %v259_v29 = vld [vmem:[%s436_s2] ss:$0 sm:$0xff] }
   0x5   :  { %v304_v34 = vld [vmem:[%s437_s5] sm:$0xff]  }
   0x6   :  { %289 = vmatpush3.bf16.msra.mxu1 %v304_v34  ;;  %v260_v38 = vld [vmem:[%s438_s4] ss:$0 sm:$0xff] }
   0x7   :  { %42 = vadd.xlane.f32.xlu0 %v41_v3  ;;  %283 = vmatpush3.bf16.msra.mxu0 %v303_v16  ;;  %v266_v56 = vld [vmem:[%s439_s6] ss:$0 sm:$0xff] }
   0x8   :  { %290 = vmatprep.subr.bf16.mxu1 %v320_v15 }
   0xa   :  { %291 = vmatpush3.bf16.msra.mxu1 %v305_v35 }
   0xb   :  { %292 = vmatprep.subr.bf16.mxu1 %v320_v15 }
   0xe   :  { %293 = vmatpush3.bf16.msra.mxu1 %v306_v36 }
   0xf   :  { %294 = vmatprep.subr.bf16.mxu1 %v320_v15 }
  0x12   :  { %295 = vmatpush3.bf16.msra.mxu1 %v307_v37 }
  0x90   :  { %v40_v4 = vpop.xlane.xlu0 %39 }
  0x91   :  { %v45_v5 = vmul.f32 0.03125, %v40_v4 }
  0x93   :  { %v47_v6 = vsub.f32 %v375_v0, %v45_v5 }
  0x94   :  { %v43_v7 = vpop.xlane.xlu0 %42 }
  0x95   :  { %v46_v8 = vmul.f32 0.03125, %v43_v7  ;;  %v49_v9 = vmul.f32 %v47_v6, %v47_v6 }
  0x97   :  { %v48_v10 = vsub.f32 %v380_v1, %v46_v8  ;;  %v51_v11 = vsel %vm37_vm0, %v49_v9, 0.0 }
  0x98   :  { %52 = vadd.xlane.f32.xlu1 %v51_v11 }
  0x99   :  { %v50_v12 = vmul.f32 %v48_v10, %v48_v10 }
  0x9b   :  { %v54_v13 = vsel %vm37_vm0, %v50_v12, 0.0 }
  0x9c   :  { %55 = vadd.xlane.f32.xlu1 %v54_v13 }
 0x125   :  { %v53_v17 = vpop.xlane.xlu1 %52 }
 0x126   :  { %v57_v18 = vmul.f32 0.03125, %v53_v17 }
 0x128   :  { %v59_v19 = vadd.f32 1e-05, %v57_v18 }
 0x129   :  { %v56_v20 = vpop.xlane.xlu1 %55 }
 0x12a   :  { %308 = vrsqrt.f32 %v59_v19  ;;  %v58_v21 = vmul.f32 0.03125, %v56_v20 }
 0x12c   :  { %v60_v22 = vadd.f32 1e-05, %v58_v21 }
 0x12e   :  { %310 = vrsqrt.f32 %v60_v22 }
 0x134   :  { %v309_v23 = vpop.eup %308 }
 0x135   :  { %v63_v24 = vmul.f32 %v309_v23, %v47_v6 }
 0x137   :  { %v71_v28 = vmul.f32 %v258_v25, %v63_v24 }
 0x138   :  { %v311_v26 = vpop.eup %310 }
 0x139   :  { %v64_v27 = vmul.f32 %v311_v26, %v48_v10  ;;  %v79_v31 = vadd.f32 %v259_v29, %v71_v28 }
 0x13b   :  { %v72_v30 = vmul.f32 %v258_v25, %v64_v27 }
 0x13d   :  { %v80_v32 = vadd.f32 %v259_v29, %v72_v30 }
 0x13f   :  { %v81_v33 = vpack.c.bf16 %v80_v32, %v79_v31 }
 0x141   :  { %285 = vmatmul.mubr.msk.bf16.vlgmr.msra.gmra.mrb[0].mxu0 %vm37_vm0, %v81_v33 }
 0x214   :  { %v142_v39 = vpop.f32.mrb[0].mxu0 }
 0x215   :  { %v143_v40 = vadd.f32 %v260_v38, %v142_v39  ;;  %v286_v41 = vpop.f32.mrb[1].mxu0 }
 0x216   :  { %v145_v42 = vpop.f32.mrb[2].mxu0 }
 0x217   :  { %v264_v43 = vmul.f32 -1.442695, %v143_v40  ;;  %v146_v44 = vadd.f32 %v260_v38, %v145_v42  ;;  %v287_v45 = vpop.f32.mrb[3].mxu0 }
 0x219   :  { %312 = vpow2.f32 %v264_v43  ;;  %v265_v46 = vmul.f32 -1.442695, %v146_v44 }
 0x21b   :  { %314 = vpow2.f32 %v265_v46 }
 0x223   :  { %v313_v47 = vpop.eup %312 }
 0x224   :  { %v155_v48 = vadd.f32 1.0, %v313_v47 }
 0x225   :  { %v315_v49 = vpop.eup %314 }
 0x226   :  { %316 = vrcp.f32 %v155_v48  ;;  %v156_v50 = vadd.f32 1.0, %v315_v49 }
 0x228   :  { %318 = vrcp.f32 %v156_v50 }
 0x230   :  { %v317_v51 = vpop.eup %316 }
 0x231   :  { %v161_v53 = vmul.f32 %v317_v51, %v143_v40 }
 0x232   :  { %v319_v52 = vpop.eup %318 }
 0x233   :  { %v162_v54 = vmul.f32 %v319_v52, %v146_v44 }
 0x235   :  { %v163_v55 = vpack.c.bf16 %v162_v54, %v161_v53 }
 0x237   :  { %297 = vmatmul.mubr.msk.bf16.vlgmr.msra.gmra.mrb[0].mxu1 %vm203_vm2, %v163_v55 }
 0x30a   :  { %v241_v57 = vpop.f32.mrb[0].mxu1 }
 0x30b   :  { %v242_v58 = vadd.f32 %v266_v56, %v241_v57  ;;  %v298_v59 = vpop.f32.mrb[1].mxu1 }
 0x30c   :  { %v244_v60 = vpop.f32.mrb[2].mxu1 }
 0x30d   :  { %v248_v61 = vmul.f32 0.5, %v242_v58  ;;  %v245_v62 = vadd.f32 %v266_v56, %v244_v60  ;;  %v299_v63 = vpop.f32.mrb[3].mxu1 }
 0x30f   :  { %v250_v2 = vadd.f32 %v248_v61, %v375_v0  ;;  %v249_v3 = vmul.f32 0.5, %v245_v62 }
 0x311   :  { %252 = vst.msk [vmem:[%s440_s9] sm:$0xff] %vm37_vm0, %v250_v2  ;;  %v251_v4 = vadd.f32 %v249_v3, %v380_v1 }
 0x313   :  { %253 = vst.msk [vmem:[%s440_s9 + $0x8] sm:$0xff] %vm37_vm0, %v251_v4 }

// kernel: run.14
= control target key start
LH: loop header
LB: loop body
LE: loop exit
PB: predicated region body
PF: predicated region fallthrough
CT: control target
= control target key end

     0   :  { %vm33_vm0 = vcmask 261120   ;;  %v289_v15 = vmov 0.0   ;;  %vm290_vm1 = vmmov 0   ;;  %vm217_vm2 = vcmask 257024   ;;  %s384_s0 = inlined_call_operand.vmem [shape: f32[16,32], index: 0, kind: input, shape index: {}]   ;;  %s385_s3 = inlined_call_operand.vmem [shape: bf16[32,32], index: 3, kind: input, shape index: {}]   ;;  %s386_s5 = inlined_call_operand.vmem [shape: bf16[32,64], index: 5, kind: input, shape index: {}]   ;;  %s387_s1 = inlined_call_operand.vmem [shape: f32[1,32], index: 1, kind: input, shape index: {}]   ;;  %s388_s2 = inlined_call_operand.vmem [shape: f32[1,32], index: 2, kind: input, shape index: {}, may-alias: {2,4}]   ;;  %s389_s4 = inlined_call_operand.vmem [shape: f32[1,32], index: 4, kind: input, shape index: {}, may-alias: {2,4}]   ;;  %s390_s6 = inlined_call_operand.vmem [shape: f32[1,64], index: 6, kind: input, shape index: {}]   ;;  %s391_s7 = inlined_call_operand.vmem [shape: bf16[16,32], index: 7, kind: output, shape index: {0}]   ;;  %s392_s8 = inlined_call_operand.vmem [shape: bf16[16,64], index: 8, kind: output, shape index: {1}]  }
   0x1   :  { %v29_v0 = vld [vmem:[%s384_s0] sm:$0xff]  ;;  %v30_v1 = vld [vmem:[%s384_s0 + $0x8] sm:$0xff]  ;;  %263 = vmatprep.subr.bf16.mxu0 %v289_v15  ;;  %271 = vmatprep.subr.bf16.mxu1 %v289_v15  ;;  %vm228_vm3 = vcmask 519168  }
   0x2   :  { %v34_v2 = vsel %vm33_vm0, %v29_v0, 0.0  ;;  %v37_v3 = vsel %vm33_vm0, %v30_v1, 0.0  ;;  %v281_v14 = vld [vmem:[%s385_s3] sm:$0xff]   ;;  %v283_v17 = vld [vmem:[%s385_s3 + $0x8] sm:$0xff]   ;;  %267 = vmatprep.mubr.msk.bf16.mxu0 %vm290_vm1, %v289_v15  ;;  %275 = vmatprep.mubr.msk.bf16.mxu1 %vm290_vm1, %v289_v15 }
   0x3   :  { %35 = vadd.xlane.f32.xlu0 %v34_v2  ;;  %v282_v16 = vld [vmem:[%s386_s5] sm:$0xff]   ;;  %264 = vmatpush3.bf16.msra.mxu0 %v281_v14  ;;  %v284_v18 = vld [vmem:[%s386_s5 + $0x8] sm:$0xff]  }
   0x4   :  { %272 = vmatpush3.bf16.msra.mxu1 %v282_v16  ;;  %265 = vmatprep.subr.bf16.mxu0 %v289_v15  ;;  %v239_v27 = vld [vmem:[%s387_s1] ss:$0 sm:$0xff] }
   0x5   :  { %273 = vmatprep.subr.bf16.mxu1 %v289_v15  ;;  %v240_v31 = vld [vmem:[%s388_s2] ss:$0 sm:$0xff] }
   0x6   :  { %v241_v36 = vld [vmem:[%s389_s4] ss:$0 sm:$0xff] }
   0x7   :  { %38 = vadd.xlane.f32.xlu0 %v37_v3  ;;  %266 = vmatpush3.bf16.msra.mxu0 %v283_v17  ;;  %v245_v37 = vld [vmem:[%s390_s6] ss:$0 sm:$0xff] }
   0x8   :  { %274 = vmatpush3.bf16.msra.mxu1 %v284_v18 }
  0x90   :  { %v36_v4 = vpop.xlane.xlu0 %35 }
  0x91   :  { %v41_v5 = vmul.f32 0.03125, %v36_v4 }
  0x93   :  { %v43_v6 = vsub.f32 %v29_v0, %v41_v5 }
  0x94   :  { %v39_v7 = vpop.xlane.xlu0 %38 }
  0x95   :  { %v42_v8 = vmul.f32 0.03125, %v39_v7  ;;  %v45_v9 = vmul.f32 %v43_v6, %v43_v6 }
  0x97   :  { %v44_v10 = vsub.f32 %v30_v1, %v42_v8  ;;  %v47_v11 = vsel %vm33_vm0, %v45_v9, 0.0 }
  0x98   :  { %48 = vadd.xlane.f32.xlu1 %v47_v11 }
  0x99   :  { %v46_v12 = vmul.f32 %v44_v10, %v44_v10 }
  0x9b   :  { %v50_v13 = vsel %vm33_vm0, %v46_v12, 0.0 }
  0x9c   :  { %51 = vadd.xlane.f32.xlu1 %v50_v13 }
 0x125   :  { %v49_v19 = vpop.xlane.xlu1 %48 }
 0x126   :  { %v53_v20 = vmul.f32 0.03125, %v49_v19 }
 0x128   :  { %v55_v21 = vadd.f32 1e-05, %v53_v20 }
 0x129   :  { %v52_v22 = vpop.xlane.xlu1 %51 }
 0x12a   :  { %285 = vrsqrt.f32 %v55_v21  ;;  %v54_v23 = vmul.f32 0.03125, %v52_v22 }
 0x12c   :  { %v56_v24 = vadd.f32 1e-05, %v54_v23 }
 0x12e   :  { %287 = vrsqrt.f32 %v56_v24 }
 0x134   :  { %v286_v25 = vpop.eup %285 }
 0x135   :  { %v59_v26 = vmul.f32 %v286_v25, %v43_v6 }
 0x137   :  { %v67_v30 = vmul.f32 %v239_v27, %v59_v26 }
 0x138   :  { %v288_v28 = vpop.eup %287 }
 0x139   :  { %v60_v29 = vmul.f32 %v288_v28, %v44_v10  ;;  %v75_v33 = vadd.f32 %v240_v31, %v67_v30 }
 0x13b   :  { %v68_v32 = vmul.f32 %v239_v27, %v60_v29 }
 0x13d   :  { %v76_v34 = vadd.f32 %v240_v31, %v68_v32 }
 0x13f   :  { %v77_v35 = vpack.c.bf16 %v76_v34, %v75_v33 }
 0x141   :  { %268 = vmatmul.mubr.msk.bf16.vlgmr.msra.gmra.mrb[0].mxu0 %vm33_vm0, %v77_v35  ;;  %276 = vmatmul.mubr.msk.bf16.vlgmr.msra.gmra.mrb[0].mxu1 %vm33_vm0, %v77_v35 }
 0x214   :  { %v138_v38 = vpop.f32.mrb[0].mxu0  ;;  %v202_v39 = vpop.f32.mrb[0].mxu1 }
 0x215   :  { %v139_v40 = vadd.f32 %v241_v36, %v138_v38  ;;  %v203_v41 = vadd.f32 %v245_v37, %v202_v39  ;;  %v269_v42 = vpop.f32.mrb[1].mxu0  ;;  %v277_v43 = vpop.f32.mrb[1].mxu1 }
 0x216   :  { %v141_v44 = vpop.f32.mrb[2].mxu0  ;;  %v205_v45 = vpop.f32.mrb[2].mxu1 }
 0x217   :  { %v253_v46 = vpack.c.bf16 %v139_v40, %v139_v40  ;;  %v255_v47 = vpack.c.bf16 %v203_v41, %v203_v41  ;;  %v142_v48 = vadd.f32 %v241_v36, %v141_v44  ;;  %v206_v49 = vadd.f32 %v245_v37, %v205_v45  ;;  %v270_v50 = vpop.f32.mrb[3].mxu0  ;;  %v278_v51 = vpop.f32.mrb[3].mxu1 }
 0x219   :  { %218 = vst.msk [vmem:[%s391_s7] sm:$0xf] %vm217_vm2, %v253_v46  ;;  %v254_v52 = vpack.c.bf16 %v142_v48, %v142_v48  ;;  %v256_v53 = vpack.c.bf16 %v206_v49, %v206_v49 }
 0x21a   :  { %229 = vst.msk [vmem:[%s392_s8] sm:$0xf] %vm228_vm3, %v255_v47 }
 0x21b   :  { %219 = vst.msk [vmem:[%s391_s7 + $0x4] sm:$0xf] %vm217_vm2, %v254_v52 }
 0x21c   :  { %230 = vst.msk [vmem:[%s392_s8 + $0x4] sm:$0xf] %vm228_vm3, %v256_v53 }

// kernel: run.15
= control target key start
LH: loop header
LB: loop body
LE: loop exit
PB: predicated region body
PF: predicated region fallthrough
CT: control target
= control target key end

     0   :  { %v124_v0 = vmov 0.0   ;;  %vm125_vm0 = vmmov 0   ;;  %vm41_vm1 = vcmask 261120   ;;  %vm94_vm2 = vcmask 257024   ;;  %s167_s1 = inlined_call_operand.vmem [shape: bf16[32,32], index: 1, kind: input, shape index: {}]   ;;  %s168_s0 = inlined_call_operand.vmem [shape: f32[16,32], index: 0, kind: input, shape index: {}]   ;;  %s169_s2 = inlined_call_operand.vmem [shape: f32[1,32], index: 2, kind: input, shape index: {}]   ;;  %s170_s3 = inlined_call_operand.vmem [shape: bf16[16,32], index: 3, kind: output, shape index: {}]  }
   0x1   :  { %112 = vmatprep.subr.bf16.mxu0 %v124_v0  ;;  %v122_v1 = vld [vmem:[%s167_s1] sm:$0xff]   ;;  %116 = vmatprep.mubr.msk.bf16.mxu0 %vm125_vm0, %v124_v0  ;;  %v123_v2 = vld [vmem:[%s167_s1 + $0x8] sm:$0xff]  }
   0x2   :  { %113 = vmatpush3.bf16.msra.mxu0 %v122_v1  ;;  %v15_v3 = vld [vmem:[%s168_s0] sm:$0xff]  ;;  %v16_v4 = vld [vmem:[%s168_s0 + $0x8] sm:$0xff] }
   0x3   :  { %114 = vmatprep.subr.bf16.mxu0 %v124_v0  ;;  %v17_v5 = vpack.c.bf16 %v16_v4, %v15_v3  ;;  %v101_v6 = vld [vmem:[%s169_s2] ss:$0 sm:$0xff] }
   0x6   :  { %115 = vmatpush3.bf16.msra.mxu0 %v123_v2 }
   0x9   :  { %117 = vmatmul.mubr.msk.bf16.vlgmr.msra.gmra.mrb[0].mxu0 %vm41_vm1, %v17_v5 }
  0xdc   :  { %v79_v7 = vpop.f32.mrb[0].mxu0 }
  0xdd   :  { %v80_v8 = vadd.f32 %v101_v6, %v79_v7  ;;  %v118_v9 = vpop.f32.mrb[1].mxu0 }
  0xde   :  { %v82_v10 = vpop.f32.mrb[2].mxu0 }
  0xdf   :  { %v107_v11 = vpack.c.bf16 %v80_v8, %v80_v8  ;;  %v83_v12 = vadd.f32 %v101_v6, %v82_v10  ;;  %v119_v13 = vpop.f32.mrb[3].mxu0 }
  0xe1   :  { %95 = vst.msk [vmem:[%s170_s3] sm:$0xf] %vm94_vm2, %v107_v11  ;;  %v108_v14 = vpack.c.bf16 %v83_v12, %v83_v12 }
  0xe3   :  { %96 = vst.msk [vmem:[%s170_s3 + $0x4] sm:$0xf] %vm94_vm2, %v108_v14 }

// kernel: run.24
= control target key start
LH: loop header
LB: loop body
LE: loop exit
PB: predicated region body
PF: predicated region fallthrough
CT: control target
= control target key end

     0   :  { %vm19_vm0 = vcmask 261120   ;;  %s167_s0 = inlined_call_operand.vmem [shape: f32[16,32], index: 0, kind: input, shape index: {}]   ;;  %s168_s1 = inlined_call_operand.vmem [shape: f32[1,32], index: 1, kind: input, shape index: {}]   ;;  %s169_s2 = inlined_call_operand.vmem [shape: f32[1,32], index: 2, kind: input, shape index: {}]   ;;  %s170_s3 = inlined_call_operand.hbm [shape: f32[16,32], index: 3, kind: output, shape index: {}]  }
   0x1   :  { %v15_v0 = vld [vmem:[%s167_s0] sm:$0xff]  ;;  %v16_v1 = vld [vmem:[%s167_s0 + $0x8] sm:$0xff] }
   0x2   :  { %8 = vsyncpa [#allocation3], 0  ;;  %v20_v2 = vsel %vm19_vm0, %v15_v0, 0.0  ;;  %v23_v3 = vsel %vm19_vm0, %v16_v1, 0.0  ;;  %v81_v21 = vld [vmem:[%s168_s1] ss:$0 sm:$0xff] }
   0x3   :  { %21 = vadd.xlane.f32.xlu0 %v20_v2  ;;  %v82_v23 = vld [vmem:[%s169_s2] ss:$0 sm:$0xff]  ;;  %s114_s19 = smov [#allocation2]  }
   0x4   :  { %s70_s20 = sshll.u32 %s114_s19, 4  ;;  %s71_s20 = int_to_ptr.vmem [resolvable:$true] %s70_s20 }
   0x5   :  { %s90_s21 = scalar_lea.vmem %s71_s20, 256  ;;  %p95_p1 = scmp.lt.s32.totalorder %s71_s20, %s71_s20 }
   0x6   :  { %p91_p0 = scmp.ne.s32.totalorder %s71_s20, %s90_s21  ;;  %p96_p2 = scmp.lt.s32.totalorder %s90_s21, %s90_s21 }
   0x7   :  { %24 = vadd.xlane.f32.xlu0 %v23_v3 }
   0x8   :  { %p97_p3 = por %p96_p2, %p95_p1 }
   0xa   :  { %p98_p4 = pnand %p97_p3, %p91_p0 }
  0x90   :  { %v22_v4 = vpop.xlane.xlu0 %21 }
  0x91   :  { %v27_v5 = vmul.f32 0.03125, %v22_v4 }
  0x93   :  { %v29_v6 = vsub.f32 %v15_v0, %v27_v5 }
  0x94   :  { %v25_v7 = vpop.xlane.xlu0 %24 }
  0x95   :  { %v28_v8 = vmul.f32 0.03125, %v25_v7  ;;  %v31_v9 = vmul.f32 %v29_v6, %v29_v6 }
  0x97   :  { %v30_v10 = vsub.f32 %v16_v1, %v28_v8  ;;  %v33_v11 = vsel %vm19_vm0, %v31_v9, 0.0 }
  0x98   :  { %34 = vadd.xlane.f32.xlu1 %v33_v11 }
  0x99   :  { %v32_v12 = vmul.f32 %v30_v10, %v30_v10 }
  0x9b   :  { %v36_v13 = vsel %vm19_vm0, %v32_v12, 0.0 }
  0x9c   :  { %37 = vadd.xlane.f32.xlu1 %v36_v13 }
 0x125   :  { %v35_v14 = vpop.xlane.xlu1 %34 }
 0x126   :  { %v39_v15 = vmul.f32 0.03125, %v35_v14 }
 0x128   :  { %v41_v16 = vadd.f32 1e-05, %v39_v15 }
 0x129   :  { %v38_v17 = vpop.xlane.xlu1 %37 }
 0x12a   :  { %86 = vrsqrt.f32 %v41_v16  ;;  %v40_v18 = vmul.f32 0.03125, %v38_v17 }
 0x12c   :  { %v42_v19 = vadd.f32 1e-05, %v40_v18 }
 0x12e   :  { %88 = vrsqrt.f32 %v42_v19 }
 0x134   :  { %v87_v20 = vpop.eup %86 }
 0x135   :  { %v45_v22 = vmul.f32 %v87_v20, %v29_v6 }
 0x137   :  { %v53_v24 = vmul.f32 %v81_v21, %v45_v22 }
 0x138   :  { %v89_v25 = vpop.eup %88 }
 0x139   :  { %v46_v26 = vmul.f32 %v89_v25, %v30_v10  ;;  %v61_v27 = vadd.f32 %v82_v23, %v53_v24 }
 0x13b   :  { %v54_v28 = vmul.f32 %v81_v21, %v46_v26  ;;  %63 = vst.msk [vmem:[#allocation2] sm:$0xff] %vm19_vm0, %v61_v27 }
 0x13d   :  { %v62_v29 = vadd.f32 %v82_v23, %v54_v28 }
 0x13f   :  { %64 = vst.msk [vmem:[#allocation2 + $0x8] sm:$0xff] %vm19_vm0, %v62_v29 }
 0x140   :  { %101 = shalt.err (!%p98_p4)
}
 0x141   :  { %s102_s22 = scalar_lea.hbm %s170_s3, 256 }
 0x142   :  { %p103_p5 = scmp.ne.s32.totalorder %s170_s3, %s102_s22  ;;  %p106_p6 = scmp.lt.u32.totalorder %s102_s22, %s170_s3 }
 0x144   :  { %p108_p7 = pnand %p106_p6, %p103_p5 }
 0x146   :  { %111 = shalt.err (!%p108_p7)
}
 0x147   :  { %s115_s27 = smov 128   ;;  %s116_s28 = smov 8  }
 0x148   :  { %76 = dma.vmem_to_hbm [thread:$0]  %s71_s20, 256, %s170_s3, [#allocation3], %s115_s27, %s115_s27, %s116_s28  }
 0x149   :  { %112 = dma.done.wait [#allocation3], 256  }
 0x14a   :  { %113 = vsyncadd [#allocation3], 4294967040 }
 0x14b   :  { %80 = vsyncpa [#allocation3], 1 }

// kernel: run.18
= control target key start
LH: loop header
LB: loop body
LE: loop exit
PB: predicated region body
PF: predicated region fallthrough
CT: control target
= control target key end

     0   :  { %vm37_vm0 = vcmask 261120   ;;  %v368_v15 = vmov 0.0   ;;  %vm369_vm1 = vmmov 0   ;;  %vm203_vm2 = vcmask 523264   ;;  %s489_s0 = inlined_call_operand.vmem [shape: f32[16,32], index: 0, kind: input, shape index: {}]   ;;  %s490_s3 = inlined_call_operand.vmem [shape: bf16[32,64], index: 3, kind: input, shape index: {}]   ;;  %s491_s1 = inlined_call_operand.vmem [shape: f32[1,32], index: 1, kind: input, shape index: {}, may-alias: {1,7}]   ;;  %s492_s2 = inlined_call_operand.vmem [shape: f32[1,32], index: 2, kind: input, shape index: {}, may-alias: {2,8}]   ;;  %s493_s5 = inlined_call_operand.vmem [shape: bf16[64,32], index: 5, kind: input, shape index: {}]   ;;  %s494_s4 = inlined_call_operand.vmem [shape: f32[1,64], index: 4, kind: input, shape index: {}]   ;;  %s495_s6 = inlined_call_operand.vmem [shape: f32[1,32], index: 6, kind: input, shape index: {}]   ;;  %s496_s7 = inlined_call_operand.vmem [shape: f32[1,32], index: 7, kind: input, shape index: {}, may-alias: {1,7}]   ;;  %s497_s8 = inlined_call_operand.vmem [shape: f32[1,32], index: 8, kind: input, shape index: {}, may-alias: {2,8}]   ;;  %s498_s9 = inlined_call_operand.vmem [shape: f32[16,32], index: 9, kind: output, shape index: {}]  }
   0x1   :  { %v423_v0 = vld [vmem:[%s489_s0] sm:$0xff]  ;;  %v428_v1 = vld [vmem:[%s489_s0 + $0x8] sm:$0xff]  ;;  %324 = vmatprep.subr.bf16.mxu0 %v368_v15  ;;  %332 = vmatprep.subr.bf16.mxu1 %v368_v15  ;;  %v350_v36 = vld [vmem:[%s493_s5 + $0x10] sm:$0xff]  }
   0x2   :  { %v38_v2 = vsel %vm37_vm0, %v423_v0, 0.0  ;;  %v41_v3 = vsel %vm37_vm0, %v428_v1, 0.0  ;;  %v346_v14 = vld [vmem:[%s490_s3] sm:$0xff]   ;;  %v347_v16 = vld [vmem:[%s490_s3 + $0x8] sm:$0xff]   ;;  %328 = vmatprep.mubr.msk.bf16.mxu0 %vm369_vm1, %v368_v15  ;;  %340 = vmatprep.mubr.msk.bf16.mxu1 %vm369_vm1, %v368_v15  ;;  %v351_v37 = vld [vmem:[%s493_s5 + $0x18] sm:$0xff]  }
   0x3   :  { %39 = vadd.xlane.f32.xlu0 %v38_v2  ;;  %325 = vmatpush3.bf16.msra.mxu0 %v346_v14  ;;  %v300_v25 = vld [vmem:[%s491_s1] ss:$0 sm:$0xff]  ;;  %v349_v35 = vld [vmem:[%s493_s5 + $0x8] sm:$0xff]  }
   0x4   :  { %326 = vmatprep.subr.bf16.mxu0 %v368_v15  ;;  %v301_v29 = vld [vmem:[%s492_s2] ss:$0 sm:$0xff] }
   0x5   :  { %v348_v34 = vld [vmem:[%s493_s5] sm:$0xff]  }
   0x6   :  { %333 = vmatpush3.bf16.msra.mxu1 %v348_v34  ;;  %v302_v38 = vld [vmem:[%s494_s4] ss:$0 sm:$0xff] }
   0x7   :  { %42 = vadd.xlane.f32.xlu0 %v41_v3  ;;  %327 = vmatpush3.bf16.msra.mxu0 %v347_v16  ;;  %v308_v56 = vld [vmem:[%s495_s6] ss:$0 sm:$0xff] }
   0x8   :  { %334 = vmatprep.subr.bf16.mxu1 %v368_v15 }
   0xa   :  { %335 = vmatpush3.bf16.msra.mxu1 %v349_v35 }
   0xb   :  { %336 = vmatprep.subr.bf16.mxu1 %v368_v15 }
   0xe   :  { %337 = vmatpush3.bf16.msra.mxu1 %v350_v36 }
   0xf   :  { %338 = vmatprep.subr.bf16.mxu1 %v368_v15 }
  0x12   :  { %339 = vmatpush3.bf16.msra.mxu1 %v351_v37 }
  0x90   :  { %v40_v4 = vpop.xlane.xlu0 %39 }
  0x91   :  { %v45_v5 = vmul.f32 0.03125, %v40_v4 }
  0x93   :  { %v47_v6 = vsub.f32 %v423_v0, %v45_v5 }
  0x94   :  { %v43_v7 = vpop.xlane.xlu0 %42 }
  0x95   :  { %v46_v8 = vmul.f32 0.03125, %v43_v7  ;;  %v49_v9 = vmul.f32 %v47_v6, %v47_v6 }
  0x97   :  { %v48_v10 = vsub.f32 %v428_v1, %v46_v8  ;;  %v51_v11 = vsel %vm37_vm0, %v49_v9, 0.0 }
  0x98   :  { %52 = vadd.xlane.f32.xlu1 %v51_v11 }
  0x99   :  { %v50_v12 = vmul.f32 %v48_v10, %v48_v10 }
  0x9b   :  { %v54_v13 = vsel %vm37_vm0, %v50_v12, 0.0 }
  0x9c   :  { %55 = vadd.xlane.f32.xlu1 %v54_v13 }
 0x125   :  { %v53_v17 = vpop.xlane.xlu1 %52 }
 0x126   :  { %v57_v18 = vmul.f32 0.03125, %v53_v17 }
 0x128   :  { %v59_v19 = vadd.f32 1e-05, %v57_v18 }
 0x129   :  { %v56_v20 = vpop.xlane.xlu1 %55 }
 0x12a   :  { %352 = vrsqrt.f32 %v59_v19  ;;  %v58_v21 = vmul.f32 0.03125, %v56_v20  ;;  %v314_v20 = vld [vmem:[%s496_s7] ss:$0 sm:$0xff] }
 0x12c   :  { %v60_v22 = vadd.f32 1e-05, %v58_v21 }
 0x12e   :  { %354 = vrsqrt.f32 %v60_v22 }
 0x134   :  { %v353_v23 = vpop.eup %352 }
 0x135   :  { %v63_v24 = vmul.f32 %v353_v23, %v47_v6  ;;  %v315_v23 = vld [vmem:[%s497_s8] ss:$0 sm:$0xff] }
 0x137   :  { %v71_v28 = vmul.f32 %v300_v25, %v63_v24 }
 0x138   :  { %v355_v26 = vpop.eup %354 }
 0x139   :  { %v64_v27 = vmul.f32 %v355_v26, %v48_v10  ;;  %v79_v31 = vadd.f32 %v301_v29, %v71_v28 }
 0x13b   :  { %v72_v30 = vmul.f32 %v300_v25, %v64_v27 }
 0x13d   :  { %v80_v32 = vadd.f32 %v301_v29, %v72_v30 }
 0x13f   :  { %v81_v33 = vpack.c.bf16 %v80_v32, %v79_v31 }
 0x141   :  { %329 = vmatmul.mubr.msk.bf16.vlgmr.msra.gmra.mrb[0].mxu0 %vm37_vm0, %v81_v33 }
 0x214   :  { %v142_v39 = vpop.f32.mrb[0].mxu0 }
 0x215   :  { %v143_v40 = vadd.f32 %v302_v38, %v142_v39  ;;  %v330_v41 = vpop.f32.mrb[1].mxu0 }
 0x216   :  { %v145_v42 = vpop.f32.mrb[2].mxu0 }
 0x217   :  { %v306_v43 = vmul.f32 -1.442695, %v143_v40  ;;  %v146_v44 = vadd.f32 %v302_v38, %v145_v42  ;;  %v331_v45 = vpop.f32.mrb[3].mxu0 }
 0x219   :  { %356 = vpow2.f32 %v306_v43  ;;  %v307_v46 = vmul.f32 -1.442695, %v146_v44 }
 0x21b   :  { %358 = vpow2.f32 %v307_v46 }
 0x223   :  { %v357_v47 = vpop.eup %356 }
 0x224   :  { %v155_v48 = vadd.f32 1.0, %v357_v47 }
 0x225   :  { %v359_v49 = vpop.eup %358 }
 0x226   :  { %360 = vrcp.f32 %v155_v48  ;;  %v156_v50 = vadd.f32 1.0, %v359_v49 }
 0x228   :  { %362 = vrcp.f32 %v156_v50 }
 0x230   :  { %v361_v51 = vpop.eup %360 }
 0x231   :  { %v161_v53 = vmul.f32 %v361_v51, %v143_v40 }
 0x232   :  { %v363_v52 = vpop.eup %362 }
 0x233   :  { %v162_v54 = vmul.f32 %v363_v52, %v146_v44 }
 0x235   :  { %v163_v55 = vpack.c.bf16 %v162_v54, %v161_v53 }
 0x237   :  { %341 = vmatmul.mubr.msk.bf16.vlgmr.msra.gmra.mrb[0].mxu1 %vm203_vm2, %v163_v55 }
 0x30a   :  { %v241_v57 = vpop.f32.mrb[0].mxu1 }
 0x30b   :  { %v242_v58 = vadd.f32 %v308_v56, %v241_v57  ;;  %v342_v59 = vpop.f32.mrb[1].mxu1 }
 0x30c   :  { %v244_v60 = vpop.f32.mrb[2].mxu1 }
 0x30d   :  { %v245_v61 = vadd.f32 %v308_v56, %v244_v60  ;;  %v343_v62 = vpop.f32.mrb[3].mxu1  ;;  %v248_v63 = vadd.f32 %v242_v58, %v423_v0 }
 0x30f   :  { %v252_v2 = vsel %vm37_vm0, %v248_v63, 0.0  ;;  %v249_v3 = vadd.f32 %v245_v61, %v428_v1 }
 0x310   :  { %253 = vadd.xlane.f32.xlu0 %v252_v2 }
 0x311   :  { %v255_v4 = vsel %vm37_vm0, %v249_v3, 0.0 }
 0x312   :  { %256 = vadd.xlane.f32.xlu1 %v255_v4 }
 0x39d   :  { %v254_v5 = vpop.xlane.xlu0 %253 }
 0x39e   :  { %v258_v6 = vmul.f32 0.03125, %v254_v5 }
 0x39f   :  { %v257_v7 = vpop.xlane.xlu1 %256 }
 0x3a0   :  { %v260_v8 = vsub.f32 %v248_v63, %v258_v6  ;;  %v259_v9 = vmul.f32 0.03125, %v257_v7 }
 0x3a2   :  { %v261_v10 = vsub.f32 %v249_v3, %v259_v9  ;;  %v262_v11 = vmul.f32 %v260_v8, %v260_v8 }
 0x3a4   :  { %v264_v12 = vsel %vm37_vm0, %v262_v11, 0.0  ;;  %v263_v13 = vmul.f32 %v261_v10, %v261_v10 }
 0x3a5   :  { %265 = vadd.xlane.f32.xlu0 %v264_v12 }
 0x3a6   :  { %v267_v0 = vsel %vm37_vm0, %v263_v13, 0.0 }
 0x3a7   :  { %268 = vadd.xlane.f32.xlu1 %v267_v0 }
 0x432   :  { %v266_v14 = vpop.xlane.xlu0 %265 }
 0x433   :  { %v270_v1 = vmul.f32 0.03125, %v266_v14 }
 0x434   :  { %v269_v15 = vpop.xlane.xlu1 %268 }
 0x435   :  { %v272_v16 = vadd.f32 1e-05, %v270_v1  ;;  %v271_v17 = vmul.f32 0.03125, %v269_v15 }
 0x437   :  { %364 = vrsqrt.f32 %v272_v16  ;;  %v273_v18 = vadd.f32 1e-05, %v271_v17 }
 0x439   :  { %366 = vrsqrt.f32 %v273_v18 }
 0x441   :  { %v365_v19 = vpop.eup %364 }
 0x442   :  { %v276_v21 = vmul.f32 %v365_v19, %v260_v8 }
 0x443   :  { %v367_v22 = vpop.eup %366 }
 0x444   :  { %v284_v24 = vmul.f32 %v314_v20, %v276_v21  ;;  %v277_v25 = vmul.f32 %v367_v22, %v261_v10 }
 0x446   :  { %v292_v26 = vadd.f32 %v315_v23, %v284_v24  ;;  %v285_v27 = vmul.f32 %v314_v20, %v277_v25 }
 0x448   :  { %294 = vst.msk [vmem:[%s498_s9] sm:$0xff] %vm37_vm0, %v292_v26  ;;  %v293_v28 = vadd.f32 %v315_v23, %v285_v27 }
 0x44a   :  { %295 = vst.msk [vmem:[%s498_s9 + $0x8] sm:$0xff] %vm37_vm0, %v293_v28 }

// kernel: run.17
= control target key start
LH: loop header
LB: loop body
LE: loop exit
PB: predicated region body
PF: predicated region fallthrough
CT: control target
= control target key end

     0   :  { %s869_s17 = smov 0   ;;  %s959_s0 = inlined_call_operand.vmem [shape: f32[2,8,32], index: 0, kind: input, shape index: {}]   ;;  %s960_s1 = inlined_call_operand.vmem [shape: f32[1,32], index: 1, kind: input, shape index: {}, may-alias: {1,7}]   ;;  %s961_s2 = inlined_call_operand.vmem [shape: f32[1,32], index: 2, kind: input, shape index: {}, may-alias: {2,8}]   ;;  %s962_s3 = inlined_call_operand.vmem [shape: bf16[32,64], index: 3, kind: input, shape index: {}]   ;;  %s963_s4 = inlined_call_operand.vmem [shape: f32[1,64], index: 4, kind: input, shape index: {}]   ;;  %s964_s5 = inlined_call_operand.vmem [shape: f32[5,32], index: 5, kind: input, shape index: {}]   ;;  %s965_s6 = inlined_call_operand.vmem [shape: f32[1,32], index: 6, kind: input, shape index: {}]   ;;  %s966_s7 = inlined_call_operand.vmem [shape: f32[1,32], index: 7, kind: input, shape index: {}, may-alias: {1,7}]   ;;  %s967_s8 = inlined_call_operand.vmem [shape: f32[1,32], index: 8, kind: input, shape index: {}, may-alias: {2,8}]   ;;  %s968_s9 = inlined_call_operand.vmem [shape: bf16[32,32], index: 9, kind: input, shape index: {}]   ;;  %s969_s10 = inlined_call_operand.vmem [shape: f32[1,32], index: 10, kind: input, shape index: {}]   ;;  %s970_s11 = inlined_call_operand.vmem [shape: f32[2,8,32], index: 11, kind: output, shape index: {}]  }
   0x1 LB: > { %s720_s18 = sadd.s32 4294967295, %s804_s17   ;;  %p724_p0 = scmp.ge.s32.totalorder %s804_s17, 1  ;;  %s804_s17 = sphi %s869_s17, %s21_s17  }
   0x2   : > { %p336_p1 = scmp.lt.s32.totalorder %s804_s17, 3 }
   0x4   : > { %p337_p2 = pnand %p724_p0, %p336_p1 }
   0x5   : > { %p374_p3 = scmp.lt.s32.totalorder (!%p337_p2), %s720_s18, 1  ;;  %vm386_vm0 = vcmask (!%p337_p2), 261120   ;;  %v782_v7 = vld [vmem:[%s962_s3] sm:$0xff] (!%p337_p2)   ;;  %v806_v8 = vmov (!%p337_p2), 0.0   ;;  %vm807_vm1 = vmmov (!%p337_p2), 0   ;;  %v783_v9 = vld [vmem:[%s962_s3 + $0x8] sm:$0xff] (!%p337_p2)   ;;  %v493_v30 = vlaneseq (!%p337_p2) }
   0x6   : > { %340 = sbr.rel (%p337_p2) target bundleno = 1264 (0x4f0), region = 64  ;;  %755 = vmatprep.subr.bf16.mxu0 (!%p337_p2), %v806_v8  ;;  %759 = vmatprep.mubr.msk.bf16.mxu0 (!%p337_p2), %vm807_vm1, %v806_v8  ;;  %v727_v14 = vld [vmem:[%s960_s1] ss:$0 sm:$0xff] (!%p337_p2)  ;;  %s808_s14 = smov (!%p337_p2), 96   ;;  %v735_v41 = vld [vmem:[%s964_s5 + $0x1] ss:$0 sm:$0xff] (!%p337_p2) }
   0x7   : > { %756 = vmatpush3.bf16.msra.mxu0 (!%p337_p2), %v782_v7  ;;  %763 = vmatprep.subr.bf16.mxu1 (!%p337_p2), %v806_v8  ;;  %v728_v16 = vld [vmem:[%s961_s2] ss:$0 sm:$0xff] (!%p337_p2)  ;;  %v494_v31 = vshrl.u32 (!%p337_p2), %v493_v30, 7  ;;  %v736_v45 = vld [vmem:[%s964_s5 + $0x2] ss:$0 sm:$0xff] (!%p337_p2) }
   0x8   : > { %757 = vmatprep.subr.bf16.mxu0 (!%p337_p2), %v806_v8  ;;  %767 = vmatprep.mubr.msk.bf16.mxu1 (!%p337_p2), %vm807_vm1, %v806_v8  ;;  %v729_v20 = vld [vmem:[%s963_s4] ss:$0 sm:$0xff] (!%p337_p2)  ;;  %v737_v50 = vld [vmem:[%s964_s5 + $0x3] ss:$0 sm:$0xff] (!%p337_p2)  ;;  %v738_v54 = vld [vmem:[%s964_s5 + $0x4] ss:$0 sm:$0xff] (!%p337_p2) }
   0x9   : > { %v496_v32 = vadd.s32 (!%p337_p2), 4294967294, %v494_v31  ;;  %v509_v33 = vadd.s32 (!%p337_p2), 4294967295, %v494_v31  ;;  %v529_v35 = vadd.s32 (!%p337_p2), 1, %v494_v31  ;;  %v734_v37 = vld [vmem:[%s964_s5] ss:$0 sm:$0xff] (!%p337_p2)  ;;  %v542_v38 = vadd.s32 (!%p337_p2), 2, %v494_v31 }
   0xa   : > { %v739_v59 = vld [vmem:[%s965_s6] ss:$0 sm:$0xff] (!%p337_p2) }
   0xb   : > { %758 = vmatpush3.bf16.msra.mxu0 (!%p337_p2), %v783_v9  ;;  %vm497_vm2 = vcmp.ge.s32.totalorder (!%p337_p2), %v496_v32, 0  ;;  %vm510_vm3 = vcmp.ge.s32.totalorder (!%p337_p2), %v509_v33, 0  ;;  %vm531_vm4 = vcmp.lt.s32.totalorder (!%p337_p2), %v529_v35, 8  ;;  %vm544_vm5 = vcmp.lt.s32.totalorder (!%p337_p2), %v542_v38, 8 }
   0xd   : > { %s972_s18 = smov (!%p374_p3, %s720_s18), 1 }
   0xe   : > { %s725_s19 = sshll.u32 %s972_s18, 3 }
   0xf   : > { %s377_s22 = scalar_lea.vmem %s959_s0, %s725_s19  ;;  %s381_s26 = scalar_lea.vmem %s970_s11, %s725_s19 }
  0x10   : > { %v885_v0 = vld [vmem:[%s377_s22] sm:$0xff] }
  0x11   : > { %v387_v1 = vsel %vm386_vm0, %v885_v0, 0.0 }
  0x12   : > { %388 = vadd.xlane.f32.xlu0 %v387_v1 }
  0x9f   : > { %v389_v2 = vpop.xlane.xlu0 %388 }
  0xa0   : > { %v391_v3 = vmul.f32 0.03125, %v389_v2 }
  0xa2   : > { %v392_v4 = vsub.f32 %v885_v0, %v391_v3 }
  0xa4   : > { %v393_v5 = vmul.f32 %v392_v4, %v392_v4 }
  0xa6   : > { %v394_v6 = vsel %vm386_vm0, %v393_v5, 0.0  ;;  %v784_v5 = vld [vmem:[%s968_s9] sm:$0xff]  }
  0xa7   : > { %395 = vadd.xlane.f32.xlu0 %v394_v6  ;;  %764 = vmatpush3.bf16.msra.mxu1 %v784_v5  ;;  %v785_v6 = vld [vmem:[%s968_s9 + $0x8] sm:$0xff]  }
  0xa8   : > { %765 = vmatprep.subr.bf16.mxu1 %v806_v8 }
  0xab   : > { %766 = vmatpush3.bf16.msra.mxu1 %v785_v6 }
 0x134   : > { %v396_v10 = vpop.xlane.xlu0 %395 }
 0x135   : > { %v397_v11 = vmul.f32 0.03125, %v396_v10 }
 0x137   : > { %v398_v12 = vadd.f32 1e-05, %v397_v11 }
 0x139   : > { %786 = vrsqrt.f32 %v398_v12  ;;  %v740_v12 = vld [vmem:[%s966_s7] ss:$0 sm:$0xff] }
 0x143   : > { %v787_v13 = vpop.eup %786 }
 0x144   : > { %v400_v15 = vmul.f32 %v787_v13, %v392_v4 }
 0x146   : > { %v407_v17 = vmul.f32 %v727_v14, %v400_v15  ;;  %v741_v14 = vld [vmem:[%s967_s8] ss:$0 sm:$0xff] }
 0x148   : > { %v414_v18 = vadd.f32 %v728_v16, %v407_v17 }
 0x14a   : > { %v415_v19 = vpack.c.bf16 %v414_v18, %v414_v18 }
 0x14c   : > { %760 = vmatmul.mubr.msk.bf16.vlgmr.msra.gmra.mrb[0].mxu0 %vm386_vm0, %v415_v19 }
 0x21f   : > { %v476_v21 = vpop.f32.mrb[0].mxu0 }
 0x220   : > { %v477_v22 = vadd.f32 %v729_v20, %v476_v21  ;;  %v761_v23 = vpop.f32.mrb[1].mxu0 }
 0x221   : > { %v479_v24 = vpop.f32.mrb[2].mxu0 }
 0x222   : > { %v733_v25 = vmul.f32 -1.442695, %v477_v22  ;;  %v762_v26 = vpop.f32.mrb[3].mxu0 }
 0x224   : > { %788 = vpow2.f32 %v733_v25 }
 0x22e   : > { %v789_v27 = vpop.eup %788 }
 0x22f   : > { %v485_v28 = vadd.f32 1.0, %v789_v27 }
 0x231   : > { %790 = vrcp.f32 %v485_v28 }
 0x23b   : > { %v791_v29 = vpop.eup %790 }
 0x23c   : > { %489 = vrot.lane.b32.xlu1 %v791_v29, %s808_s14 }
 0x2ae   : > { %v490_v34 = vpop.permute.xlu1 %489 }
 0x2af   : > { %v492_v36 = vmul.f32 %v490_v34, %v477_v22  ;;  %v743_v22 = vld [vmem:[%s969_s10] ss:$0 sm:$0xff] }
 0x2b1   : > { %v495_v39 = vrot.slane %v492_v36, 6  ;;  %v508_v40 = vrot.slane %v492_v36, 7  ;;  %v528_v42 = vrot.slane %v492_v36, 1  ;;  %v541_v46 = vrot.slane %v492_v36, 2 }
 0x2b2   : > { %v526_v52 = vmul.f32 %v736_v45, %v492_v36 }
 0x2b3   : > { %v500_v43 = vsel %vm497_vm2, %v495_v39, 0.0  ;;  %v513_v44 = vsel %vm510_vm3, %v508_v40, 0.0  ;;  %v533_v49 = vsel %vm531_vm4, %v528_v42, 0.0  ;;  %v546_v53 = vsel %vm544_vm5, %v541_v46, 0.0 }
 0x2b4   : > { %v506_v47 = vmul.f32 %v734_v37, %v500_v43  ;;  %v519_v48 = vmul.f32 %v735_v41, %v513_v44  ;;  %v539_v56 = vmul.f32 %v737_v50, %v533_v49  ;;  %v552_v58 = vmul.f32 %v738_v54, %v546_v53 }
 0x2b6   : > { %v520_v51 = vadd.f32 %v519_v48, %v506_v47 }
 0x2b8   : > { %v527_v55 = vadd.f32 %v526_v52, %v520_v51 }
 0x2ba   : > { %v540_v57 = vadd.f32 %v539_v56, %v527_v55 }
 0x2bc   : > { %v553_v60 = vadd.f32 %v552_v58, %v540_v57 }
 0x2be   : > { %v561_v61 = vadd.f32 %v739_v59, %v553_v60 }
 0x2c0   : > { %v564_v62 = vsel %vm386_vm0, %v561_v61, 0.0 }
 0x2c1   : > { %565 = vadd.xlane.f32.xlu1 %v564_v62 }
 0x34e   : > { %v566_v63 = vpop.xlane.xlu1 %565 }
 0x34f   : > { %v567_v1 = vmul.f32 0.03125, %v566_v63 }
 0x351   : > { %v568_v2 = vsub.f32 %v561_v61, %v567_v1 }
 0x353   : > { %v569_v3 = vmul.f32 %v568_v2, %v568_v2 }
 0x355   : > { %v570_v4 = vsel %vm386_vm0, %v569_v3, 0.0 }
 0x356   : > { %571 = vadd.xlane.f32.xlu0 %v570_v4 }
 0x3e3   : > { %v572_v7 = vpop.xlane.xlu0 %571 }
 0x3e4   : > { %v573_v9 = vmul.f32 0.03125, %v572_v7 }
 0x3e6   : > { %v574_v10 = vadd.f32 1e-05, %v573_v9 }
 0x3e8   : > { %792 = vrsqrt.f32 %v574_v10 }
 0x3f2   : > { %v793_v11 = vpop.eup %792 }
 0x3f3   : > { %v576_v13 = vmul.f32 %v793_v11, %v568_v2 }
 0x3f5   : > { %v583_v15 = vmul.f32 %v740_v12, %v576_v13 }
 0x3f7   : > { %v590_v16 = vadd.f32 %v741_v14, %v583_v15 }
 0x3f9   : > { %v742_v17 = vmul.f32 -1.442695, %v590_v16 }
 0x3fb   : > { %794 = vpow2.f32 %v742_v17 }
 0x405   : > { %v795_v8 = vpop.eup %794 }
 0x406   : > { %v594_v18 = vadd.f32 1.0, %v795_v8 }
 0x408   : > { %796 = vrcp.f32 %v594_v18 }
 0x412   : > { %v797_v19 = vpop.eup %796 }
 0x413   : > { %v597_v20 = vmul.f32 %v797_v19, %v590_v16 }
 0x415   : > { %v598_v21 = vpack.c.bf16 %v597_v20, %v597_v20 }
 0x417   : > { %768 = vmatmul.mubr.msk.bf16.vlgmr.msra.gmra.mrb[0].mxu1 %vm386_vm0, %v598_v21 }
 0x4ea   : > { %v659_v23 = vpop.f32.mrb[0].mxu1 }
 0x4eb   : > { %v660_v24 = vadd.f32 %v743_v22, %v659_v23  ;;  %v769_v25 = vpop.f32.mrb[1].mxu1 }
 0x4ec   : > { %v662_v26 = vpop.f32.mrb[2].mxu1 }
 0x4ed   : > { %v665_v27 = vadd.f32 %v660_v24, %v885_v0  ;;  %v770_v28 = vpop.f32.mrb[3].mxu1 }
 0x4ef   : > { %666 = vst.msk [vmem:[%s381_s26] sm:$0xff] %vm386_vm0, %v665_v27 }
 0x4f0 PF: > { %s21_s17 = sadd.s32 1, %s804_s17  }
 0x4f1   : > { %p18_p4 = scmp.ge.s32.totalorder %s21_s17, 4  }
 0x4f3   :  { %20 = sbr.rel (!%p18_p4) target bundleno = 1 (0x1), region = 94 }

// kernel: run.16
= control target key start
LH: loop header
LB: loop body
LE: loop exit
PB: predicated region body
PF: predicated region fallthrough
CT: control target
= control target key end

     0   :  { %s1061_s27 = smov 0   ;;  %s1063_s28 = smov 0   ;;  %s1152_s0 = inlined_call_operand.vmem [shape: bf16[2,8,32], index: 0, kind: input, shape index: {}]   ;;  %s1153_s1 = inlined_call_operand.vmem [shape: bf16[2,8,64], index: 1, kind: input, shape index: {}]   ;;  %s1154_s2 = inlined_call_operand.vmem [shape: bf16[2,2,8,8], index: 2, kind: input, shape index: {}]   ;;  %s1155_s3 = inlined_call_operand.vmem [shape: f32[2,1,8], index: 3, kind: input, shape index: {}]   ;;  %s1156_s4 = inlined_call_operand.vmem [shape: f32[1,32], index: 4, kind: input, shape index: {}]   ;;  %s1157_s5 = inlined_call_operand.vmem [shape: bf16[32,32], index: 5, kind: input, shape index: {}]   ;;  %s1158_s6 = inlined_call_operand.vmem [shape: f32[1,32], index: 6, kind: input, shape index: {}]   ;;  %s1159_s7 = inlined_call_operand.vmem [shape: f32[2,8,32], index: 7, kind: input, shape index: {}]   ;;  %s1160_s8 = inlined_call_operand.vmem [shape: f32[2,8,32], index: 8, kind: output, shape index: {}]  }
   0x1   :  { %s1065_s29 = smov 0  }
   0x2 LB: > { %s30_s30 = sadd.s32 1, %s1004_s28  ;;  %p880_p0 = scmp.ge.s32.totalorder %s1008_s29, 1  ;;  %s1008_s29 = sphi %s1065_s29, %s18_s29   ;;  %s1004_s28 = sphi %s1063_s28, %s1162_s28   ;;  %s1000_s27 = sphi %s1061_s27, %s1161_s27  }
   0x3   : > { %p32_p1 = scmp.ge.s32.totalorder %s30_s30, 2  ;;  %p326_p2 = scmp.lt.s32.totalorder %s1008_s29, 3 }
   0x5   : > { %s1164_s30 = smov (%p32_p1, %s30_s30), 0  ;;  %p327_p3 = pnand %p880_p0, %p326_p2 }
   0x6   : > { %p386_p4 = scmp.lt.s32.totalorder (!%p327_p3), %s1000_s27, 1  ;;  %v1010_v0 = vmov (!%p327_p3), 0.0   ;;  %vm1011_vm0 = vmmov (!%p327_p3), 0   ;;  %vm438_vm1 = vcmask (!%p327_p3), 130048   ;;  %v887_v2 = vld [vmem:[%s1156_s4] ss:$0 sm:$0xff] (!%p327_p3) }
   0x7   : > { %330 = sbr.rel (%p327_p3) target bundleno = 1646 (0x66e), region = 52  ;;  %913 = vmatprep.subr.bf16.mxu0 (!%p327_p3), %v1010_v0  ;;  %915 = vmatprep.mubr.msk.bf16.mxu0 (!%p327_p3), %vm1011_vm0, %v1010_v0  ;;  %vm492_vm2 = vcmask (!%p327_p3), 64512   ;;  %s1012_s25 = smov (!%p327_p3), 96   ;;  %vm513_vm3 = vcmask (!%p327_p3), 1043456   ;;  %v976_v56 = vld [vmem:[%s1157_s5] sm:$0xff] (!%p327_p3)   ;;  %v977_v57 = vld [vmem:[%s1157_s5 + $0x8] sm:$0xff] (!%p327_p3)  }
   0x8   : > { %919 = vmatprep.subr.bf16.mxu1 (!%p327_p3), %v1010_v0  ;;  %921 = vmatprep.mubr.msk.bf16.mxu1 (!%p327_p3), %vm1011_vm0, %v1010_v0  ;;  %s1013_s26 = smov (!%p327_p3), 112   ;;  %s1015_s13 = smov (!%p327_p3), 16   ;;  %vm701_vm4 = vcmask (!%p327_p3), 261120  }
   0xe   : > { %s1166_s27 = smov (!%p386_p4, %s1000_s27), 1 }
   0xf   : > { %s881_s9 = sshll.u32 %s1166_s27, 2  ;;  %s1099_s18 = sshll.u32 %s1166_s27, 3 }
  0x10   : > { %s392_s12 = scalar_lea.vmem %s1152_s0, %s881_s9  ;;  %s396_s15 = scalar_lea.vmem %s1153_s1, %s881_s9 }
  0x11   : > { %v423_v1 = vld [vmem:[%s392_s12] sm:$0xf]  ;;  %s404_s21 = scalar_lea.vmem %s1154_s2, %s1099_s18  ;;  %s407_s24 = scalar_lea.vmem %s1155_s3, %s1166_s27 }
  0x12   : > { %v433_v3 = vld [vmem:[%s396_s15] sm:$0xf]  ;;  %v424_v4 = vunpack.c.l.bf16 %v423_v1  ;;  %s1014_s27 = smov 80   ;;  %s414_s16 = scalar_lea.vmem %s1159_s7, %s1099_s18 }
  0x13   : > { %v443_v5 = vsel %vm438_vm1, %v433_v3, 0  ;;  %v436_v8 = vld [vmem:[%s404_s21] sm:$0xff]   ;;  %v890_v18 = vcombine.low %v433_v3, %v433_v3  ;;  %s421_s22 = scalar_lea.vmem %s1160_s8, %s1099_s18 }
  0x14   : > { %914 = vmatpush3.bf16.xpose.msra.mxu0 %v443_v5  ;;  %v432_v6 = vadd.f32 %v887_v2, %v424_v4  ;;  %v437_v9 = vunpack.c.l.bf16 %v436_v8  ;;  %v889_v11 = vld [vmem:[%s407_s24] ss:$0 sm:$0xff]  ;;  %v559_v37 = vunpack.c.h.bf16 %v436_v8 }
  0x15   : > { %931 = vmatprep.subr.bf16.mxu0 %v1010_v0  ;;  %508 = vrot.lane.b32.xlu1 %v890_v18, %s1012_s25  ;;  %v745_v3 = vld [vmem:[%s414_s16] sm:$0xff] }
  0x16   : > { %v435_v7 = vpack.c.bf16 %v432_v6, %v432_v6 }
  0x19   : > { %563 = vrot.lane.b32.xlu1 %v890_v18, %s1013_s26 }
  0x1b   : > { %916 = vmatmul.mubr.msk.bf16.vlgmr.msra.gmra.mrb[0].mxu0 %vm438_vm1, %v435_v7 }
  0x1c   : > { %933 = vmatprep.mubr.msk.bf16.mxu0 %vm1011_vm0, %v1010_v0 }
  0x87   : > { %v509_v24 = vpop.permute.xlu1 %508 }
  0x88   : > { %v515_v25 = vsel %vm513_vm3, %v509_v24, 0 }
  0x89   : > { %920 = vmatpush3.bf16.msra.mxu1 %v515_v25 }
  0x8a   : > { %925 = vmatprep.subr.bf16.mxu1 %v1010_v0 }
  0x8b   : > { %v564_v28 = vpop.permute.xlu1 %563 }
  0x8c   : > { %v569_v30 = vsel %vm438_vm1, %v564_v28, 0 }
  0xee   : > { %v479_v10 = vpop.f32.mrb[0].mxu0 }
  0xef   : > { %v480_v12 = vadd.f32 %v479_v10, %v437_v9  ;;  %v917_v13 = vpop.f32.mrb[1].mxu0 }
  0xf0   : > { %v482_v14 = vpop.f32.mrb[2].mxu0 }
  0xf1   : > { %v918_v15 = vpop.f32.mrb[3].mxu0  ;;  %v491_v16 = vadd.f32 %v889_v11, %v480_v12 }
  0xf3   : > { %v493_v17 = vsel %vm492_vm2, %v491_v16, -inf }
  0xf4   : > { %494 = vmax.xlane.f32.xlu0 %v493_v17 }
 0x181   : > { %v495_v19 = vpop.xlane.xlu0 %494 }
 0x182   : > { %v496_v20 = vsub.f32 %v491_v16, %v495_v19 }
 0x184   : > { %v497_v21 = vmul.f32 1.442695, %v496_v20 }
 0x186   : > { %978 = vpow2.f32 %v497_v21 }
 0x190   : > { %v979_v22 = vpop.eup %978 }
 0x191   : > { %v499_v23 = vsel %vm492_vm2, %v979_v22, 0.0 }
 0x192   : > { %500 = vadd.xlane.f32.xlu0 %v499_v23 }
 0x1a8   : > { %561 = vrot.lane.b32.xlu0 %v435_v7, %s1013_s26 }
 0x21f   : > { %v501_v26 = vpop.xlane.xlu0 %500 }
 0x220   : > { %980 = vrcp.f32 %v501_v26 }
 0x223   : > { %v562_v32 = vpop.permute.xlu0 %561 }
 0x22a   : > { %v981_v27 = vpop.eup %980 }
 0x22b   : > { %v503_v29 = vmul.f32 %v981_v27, %v979_v22 }
 0x22d   : > { %v504_v31 = vpack.c.bf16 %v503_v29, %v503_v29 }
 0x22f   : > { %922 = vmatmul.mubr.msk.bf16.vlgmr.msra.gmra.mrb[0].mxu1 %vm492_vm2, %v504_v31 }
 0x230   : > { %926 = vmatpush3.bf16.xpose.msra.mxu1 %v569_v30  ;;  %927 = vmatprep.mubr.msk.bf16.mxu1 %vm1011_vm0, %v1010_v0 }
 0x231   : > { %937 = vmatprep.subr.bf16.mxu1 %v1010_v0 }
 0x237   : > { %928 = vmatmul.mubr.msk.bf16.vlgmr.msra.gmra.mrb[4].mxu1 %vm438_vm1, %v562_v32 }
 0x238   : > { %941 = vmatprep.mubr.msk.bf16.mxu1 %vm1011_vm0, %v1010_v0  ;;  %938 = vmatpush3.bf16.msra.mxu1 %v976_v56 }
 0x239   : > { %939 = vmatprep.subr.bf16.mxu1 %v1010_v0  ;;  %v895_v0 = vld [vmem:[%s1158_s6] ss:$0 sm:$0xff] }
 0x23c   : > { %940 = vmatpush3.bf16.msra.mxu1 %v977_v57 }
 0x302   : > { %v551_v33 = vpop.f32.mrb[0].mxu1 }
 0x303   : > { %v923_v34 = vpop.f32.mrb[1].mxu1 }
 0x304   : > { %v554_v35 = vpop.f32.mrb[2].mxu1 }
 0x305   : > { %v924_v36 = vpop.f32.mrb[3].mxu1 }
 0x30a   : > { %v605_v38 = vpop.f32.mrb[4].mxu1 }
 0x30b   : > { %v606_v39 = vadd.f32 %v605_v38, %v559_v37  ;;  %v929_v40 = vpop.f32.mrb[5].mxu1 }
 0x30c   : > { %v608_v41 = vpop.f32.mrb[6].mxu1 }
 0x30d   : > { %v930_v42 = vpop.f32.mrb[7].mxu1  ;;  %v611_v43 = vadd.f32 %v889_v11, %v606_v39 }
 0x30f   : > { %v612_v44 = vsel %vm492_vm2, %v611_v43, -inf }
 0x310   : > { %613 = vmax.xlane.f32.xlu1 %v612_v44 }
 0x321   : > { %624 = vrot.lane.b32.xlu1 %v890_v18, %s1014_s27 }
 0x39d   : > { %v614_v45 = vpop.xlane.xlu1 %613 }
 0x39e   : > { %v615_v46 = vsub.f32 %v611_v43, %v614_v45 }
 0x3a0   : > { %v616_v47 = vmul.f32 1.442695, %v615_v46 }
 0x3a1   : > { %v625_v50 = vpop.permute.xlu1 %624 }
 0x3a2   : > { %982 = vpow2.f32 %v616_v47  ;;  %v630_v51 = vsel %vm513_vm3, %v625_v50, 0 }
 0x3a3   : > { %932 = vmatpush3.bf16.msra.mxu0 %v630_v51 }
 0x3ac   : > { %v983_v48 = vpop.eup %982 }
 0x3ad   : > { %v618_v49 = vsel %vm492_vm2, %v983_v48, 0.0 }
 0x3ae   : > { %619 = vadd.xlane.f32.xlu0 %v618_v49 }
 0x43b   : > { %v620_v52 = vpop.xlane.xlu0 %619 }
 0x43c   : > { %984 = vrcp.f32 %v620_v52 }
 0x446   : > { %v985_v53 = vpop.eup %984 }
 0x447   : > { %v622_v54 = vmul.f32 %v985_v53, %v983_v48 }
 0x449   : > { %v623_v55 = vpack.c.bf16 %v622_v54, %v622_v54 }
 0x44b   : > { %934 = vmatmul.mubr.msk.bf16.vlgmr.msra.gmra.mrb[4].mxu0 %vm492_vm2, %v623_v55 }
 0x51e   : > { %v666_v58 = vpop.f32.mrb[4].mxu0 }
 0x51f   : > { %673 = vrot.lane.b32.xlu0 %v666_v58, %s1015_s13  ;;  %v935_v59 = vpop.f32.mrb[5].mxu0 }
 0x520   : > { %v669_v60 = vpop.f32.mrb[6].mxu0 }
 0x521   : > { %v936_v61 = vpop.f32.mrb[7].mxu0 }
 0x591   : > { %v674_v62 = vpop.permute.xlu0 %673 }
 0x592   : > { %v676_v63 = vsel %vm438_vm1, %v551_v33, %v674_v62 }
 0x593   : > { %v677_v1 = vpack.c.bf16 %v676_v63, %v676_v63 }
 0x595   : > { %942 = vmatmul.mubr.msk.bf16.vlgmr.msra.gmra.mrb[8].mxu1 %vm701_vm4, %v677_v1 }
 0x668   : > { %v739_v2 = vpop.f32.mrb[8].mxu1 }
 0x669   : > { %v740_v4 = vadd.f32 %v895_v0, %v739_v2  ;;  %v943_v5 = vpop.f32.mrb[9].mxu1 }
 0x66a   : > { %v742_v6 = vpop.f32.mrb[10].mxu1 }
 0x66b   : > { %v746_v7 = vadd.f32 %v745_v3, %v740_v4  ;;  %v944_v8 = vpop.f32.mrb[11].mxu1 }
 0x66d   : > { %747 = vst.msk [vmem:[%s421_s22] sm:$0xff] %vm701_vm4, %v746_v7 }
 0x66e PF: > { %s18_s29 = sadd.s32 1, %s1008_s29   ;;  %s1161_s27 = smov %s1004_s28 }
 0x66f   : > { %p15_p5 = scmp.ge.s32.totalorder %s18_s29, 4   ;;  %s1162_s28 = smov %s1164_s30 }
 0x671   :  { %17 = sbr.rel (!%p15_p5) target bundleno = 2 (0x2), region = 95 }

</bundles_post_ra>
